<compile_context>
chip_gen: v7x
topology: tpu7x:2x2x1
jax: 0.10.0
libtpu: 0.0.40
codegen_flags: <defaults>
</compile_context>

<pallas_src>
import functools

import jax
import jax.numpy as jnp
from jax.experimental import pallas as pl
from jax.experimental.pallas import tpu as pltpu


def _round_up(x, m):
    return (x + m - 1) // m * m


def _textcnn_kernel(x_ref, w_ref, b_ref, lim_ref, fcw_ref, fcb_ref, out_ref,
                    *, tile_n, s_pad, mc, kmax, d, fold_taps):
    """One batch tile: fused conv (all kernel sizes) + ReLU + global max-pool + FC.

    x_ref:   (tile_n*s_pad, D)   embedded tokens, sample-major, zero padded
    w_ref:   (kmax*D, C3P)       stacked conv weights, tap-major rows, zero-padded taps/channels
    b_ref:   (1, C3P) f32        stacked conv bias (zero-padded channels)
    lim_ref: (1, C3P) int32      per-channel valid length (S - K + 1); 0 for padded channels
    fcw_ref: (C3P, CLSP)         fc weight, pre-transposed, zero padded
    fcb_ref: (1, CLSP) f32       fc bias, zero padded
    out_ref: (tile_n, CLSP)      logits for this batch tile (lane-dense store)
    """
    c3p = b_ref.shape[1]
    emb = x_ref[...]                                     # (tile_n*s_pad, D)

    # ---- fused convolution (batch and time folded into one M axis) ----
    if fold_taps:
        # D < 128: fold taps into the contraction -> one MXU pass, contraction kmax*D.
        lhs = jnp.concatenate([emb[k:k + mc, :] for k in range(kmax)], axis=1)
        acc = jnp.dot(lhs, w_ref[...], preferred_element_type=jnp.float32)
    else:
        acc = jnp.dot(emb[0:mc, :], w_ref[0:d, :], preferred_element_type=jnp.float32)
        for k in range(1, kmax):                         # static, small (kmax ~ 5)
            acc = acc + jnp.dot(emb[k:k + mc, :], w_ref[k * d:(k + 1) * d, :],
                                preferred_element_type=jnp.float32)
    acc = jnp.maximum(acc + b_ref[...], 0.0)             # bias + ReLU, f32, (mc, C3P)

    # ---- vectorized global max-pool over time (no scratch round trip) ----
    cut = tile_n * s_pad - mc                            # masked tail rows (multiple of 8)
    if cut:
        acc = jnp.concatenate([acc, jnp.zeros((cut, c3p), jnp.float32)], axis=0)
    acc3 = acc.reshape(tile_n, s_pad, c3p)               # tile-aligned, layout-preserving

    # position t of a sample is valid for channel j iff t < (S - K_j + 1).  Forcing
    # invalid positions to 0 is safe only because pooling happens AFTER ReLU (>= 0).
    pos = jax.lax.broadcasted_iota(jnp.int32, (s_pad, c3p), 0)
    valid = pos < lim_ref[...]                           # (s_pad, C3P)
    feats = jnp.max(jnp.where(valid[None, :, :], acc3, 0.0), axis=1)   # (tile_n, C3P)

    # ---- dropout (eval) = identity; batched FC with a lane-dense output slab ----
    logits = jnp.dot(feats.astype(fcw_ref.dtype), fcw_ref[...],
                     preferred_element_type=jnp.float32)
    out_ref[...] = (logits + fcb_ref[...]).astype(out_ref.dtype)


def cnn_forward(x_tokens, emb_table, conv_ws, conv_bs, fc_w, fc_b,
                *, tile_n=128, compute_dtype=jnp.bfloat16,
                vmem_target_bytes=48 * 1024 * 1024):
    """TextCNN forward.  x_tokens: (N, S) int32 token ids -> logits (N, class_num) f32.

    compute_dtype=bfloat16 halves HBM/VMEM traffic (f32 accumulation is kept);
    pass jnp.float32 for a bit-accurate check.
    """
    N, S = x_tokens.shape
    D = int(emb_table.shape[1])
    Ks = [int(w.shape[2]) for w in conv_ws]
    C = int(conv_ws[0].shape[0])
    c3 = len(Ks) * C
    class_num = int(fc_w.shape[0])
    kmin, kmax = min(Ks), max(Ks)
    assert S >= kmax, "sequence length must be >= largest conv kernel size"

    itemsize = jnp.dtype(compute_dtype).itemsize
    c3_pad = _round_up(c3, 128)                  # lane-dense conv channels / MXU N dim
    cls_pad = _round_up(class_num, 128)          # lane-dense logits store
    cut = _round_up(kmax - 1, 8)                 # tail rows so tap slices stay in-sample
    pool_len = _round_up(S - kmin + 1, 8)        # rows pooled per sample
    s_pad = pool_len + cut                       # per-sample padded length (multiple of 8)
    # Cross-sample tap reads are prevented only by these invariants -- keep them explicit.
    assert cut >= kmax - 1 and pool_len >= S - kmin + 1 and s_pad % 8 == 0
    fold_taps = D < 128
    kd = kmax * D if fold_taps else D

    # ---- batch-tile selection: amortize grid-step overhead, stay inside a v7x-safe
    #      VMEM budget, keep >= 2 blocks so both v7x TensorCores get "parallel" work ----
    tile_n = max(8, _round_up(int(tile_n), 8))
    if N > 8:
        tile_n = min(tile_n, max(8, _round_up((N + 1) // 2, 8)))

    def _vmem_bytes(tn):
        x_blk = tn * s_pad * D * itemsize                 # double-buffered input block
        out_blk = tn * cls_pad * 4                        # double-buffered output block
        acc = tn * s_pad * c3_pad * 4                     # conv/ReLU f32 value slab
        lhs = tn * s_pad * kd * itemsize                  # folded-tap LHS value
        w_bytes = (kmax * D * c3_pad + c3_pad * cls_pad) * itemsize + 3 * c3_pad * 4
        return 2 * x_blk + 2 * out_blk + acc + lhs + w_bytes

    while tile_n > 8 and _vmem_bytes(tile_n) > vmem_target_bytes:
        tile_n -= 8

    n_pad = _round_up(max(N, tile_n), tile_n)
    mc = tile_n * s_pad - cut                             # conv-output rows per block
    num_blocks = n_pad // tile_n
    vmem_limit = int(max(32 * 1024 * 1024,
                         min(64 * 1024 * 1024, 2 * _vmem_bytes(tile_n))))

    # ---- plain-JAX glue: embedding gather, padding, weight re-layout ----
    # TODO(synk): move the embedding gather in-kernel (scalar-prefetch token ids + DMA row
    # gather from the HBM table) to avoid writing/re-reading the (N, S, D) slab via HBM.
    x_emb = emb_table[x_tokens].astype(compute_dtype)                  # (N, S, D)
    x_emb = jnp.pad(x_emb, ((0, n_pad - N), (0, s_pad - S), (0, 0)))
    x_flat = x_emb.reshape(n_pad * s_pad, D)                           # (n_pad*s_pad, D)

    w_groups, b_groups, lim_groups = [], [], []
    for w, b, K in zip(conv_ws, conv_bs, Ks):
        wg = jnp.transpose(w[:, 0, :, :], (1, 2, 0))                   # (K, D, C)
        w_groups.append(jnp.pad(wg, ((0, kmax - K), (0, 0), (0, 0))))  # zero-pad taps
        b_groups.append(b.reshape(1, -1))
        lim_groups.append(jnp.full((1, int(b.shape[0])), S - K + 1, jnp.int32))
    w_stack = jnp.concatenate(w_groups, axis=2)                        # (kmax, D, 3C)
    w_stack = jnp.pad(w_stack, ((0, 0), (0, 0), (0, c3_pad - c3)))     # lane-pad channels
    w_fold = w_stack.reshape(kmax * D, c3_pad).astype(compute_dtype)   # (kmax*D, C3P)
    b_stack = jnp.pad(jnp.concatenate(b_groups, axis=1),
                      ((0, 0), (0, c3_pad - c3))).astype(jnp.float32)  # (1, C3P)
    limits = jnp.pad(jnp.concatenate(lim_groups, axis=1),
                     ((0, 0), (0, c3_pad - c3)))                       # (1, C3P) int32

    fcw = jnp.pad(jnp.transpose(fc_w),
                  ((0, c3_pad - c3), (0, cls_pad - class_num))).astype(compute_dtype)
    fcb = jnp.pad(fc_b.reshape(1, -1),
                  ((0, 0), (0, cls_pad - class_num))).astype(jnp.float32)

    def _full(arr):                                   # grid-invariant, DMA'd once
        return pl.BlockSpec(arr.shape, lambda i: (0, 0))

    grid_spec = pltpu.PrefetchScalarGridSpec(
        num_scalar_prefetch=0,
        grid=(num_blocks,),
        in_specs=[
            pl.BlockSpec((tile_n * s_pad, D), lambda i: (i, 0)),
            _full(w_fold), _full(b_stack), _full(limits), _full(fcw), _full(fcb),
        ],
        out_specs=pl.BlockSpec((tile_n, cls_pad), lambda i: (i, 0)),
    )

    # Cost estimate: grid-invariant weights counted once (constant index maps).
    flops = (2 * num_blocks * mc * (kmax * D) * c3_pad
             + 2 * n_pad * c3_pad * cls_pad)
    bytes_accessed = (x_flat.size * itemsize
                      + (w_fold.size + fcw.size) * itemsize
                      + (b_stack.size + fcb.size) * 4 + limits.size * 4
                      + n_pad * cls_pad * 4)

    kernel = functools.partial(_textcnn_kernel, tile_n=tile_n, s_pad=s_pad, mc=mc,
                               kmax=kmax, d=D, fold_taps=fold_taps)

    out = pl.pallas_call(
        kernel,
        out_shape=jax.ShapeDtypeStruct((n_pad, cls_pad), jnp.float32),
        grid_spec=grid_spec,
        compiler_params=pltpu.CompilerParams(
            dimension_semantics=("parallel",),
            vmem_limit_bytes=vmem_limit),
        cost_estimate=pl.CostEstimate(flops=int(flops), transcendentals=0,
                                      bytes_accessed=int(bytes_accessed)),
    )(x_flat, w_fold, b_stack, limits, fcw, fcb)
    return out[:N, :class_num]


def _reference_forward(x_tokens, emb_table, conv_ws, conv_bs, fc_w, fc_b):
    """Pure-JAX reference of the PyTorch TextCNN forward (eval mode)."""
    x = emb_table[x_tokens].astype(jnp.float32)          # (N, S, D)
    S = x.shape[1]
    feats = []
    for w, b in zip(conv_ws, conv_bs):
        K = int(w.shape[2])
        L = S - K + 1
        acc = jnp.zeros((x.shape[0], L, int(w.shape[0])), jnp.float32) + b[None, None, :]
        for k in range(K):
            acc = acc + jnp.einsum('nld,cd->nlc', x[:, k:k + L, :], w[:, 0, k, :],
                                   precision=jax.lax.Precision.HIGHEST)
        feats.append(jnp.max(jax.nn.relu(acc), axis=1))
    f = jnp.concatenate(feats, axis=1)
    return jnp.dot(f, fc_w.T, precision=jax.lax.Precision.HIGHEST) + fc_b[None, :]


if __name__ == "__main__":
    # Small shapes consistent with the module's forward pass.
    embed_num = 50
    embed_dim = 32
    seq_len = 16
    batch = 16                 # exercises >= 2 grid blocks
    channel_out = 8            # args.kernel_num
    kernel_sizes = (3, 4, 5)   # args.kernel_size
    class_num = 4

    keys = jax.random.split(jax.random.PRNGKey(0), 10)
    emb_table = 0.1 * jax.random.normal(keys[0], (embed_num, embed_dim), jnp.float32)
    conv_ws, conv_bs = [], []
    for i, K in enumerate(kernel_sizes):
        conv_ws.append(0.1 * jax.random.normal(keys[1 + i],
                                               (channel_out, 1, K, embed_dim), jnp.float32))
        conv_bs.append(0.1 * jax.random.normal(keys[4 + i], (channel_out,), jnp.float32))
    fc_w = 0.1 * jax.random.normal(keys[7], (class_num, len(kernel_sizes) * channel_out),
                                   jnp.float32)
    fc_b = 0.1 * jax.random.normal(keys[8], (class_num,), jnp.float32)
    x = jax.random.randint(keys[9], (batch, seq_len), 0, embed_num, jnp.int32)

    ref = _reference_forward(x, emb_table, conv_ws, conv_bs, fc_w, fc_b)

    # f32 path: tight check against the pure-JAX reference.
    logits_f32 = cnn_forward(x, emb_table, conv_ws, conv_bs, fc_w, fc_b,
                             compute_dtype=jnp.float32)
    jax.block_until_ready(logits_f32)
    assert logits_f32.shape == (batch, class_num), logits_f32.shape
    assert jnp.allclose(logits_f32, ref, atol=5e-3, rtol=5e-2), \
        float(jnp.max(jnp.abs(logits_f32 - ref)))

    # bf16 path (default; halves HBM/VMEM traffic, f32 accumulation kept).
    logits_bf16 = cnn_forward(x, emb_table, conv_ws, conv_bs, fc_w, fc_b)
    jax.block_until_ready(logits_bf16)
    assert logits_bf16.shape == (batch, class_num), logits_bf16.shape
    assert jnp.allclose(logits_bf16, ref, atol=3e-2, rtol=5e-2), \
        float(jnp.max(jnp.abs(logits_bf16 - ref)))

    print("KERNEL_OK")
</pallas_src>

<mosaic_0001>
module attributes {stable_mosaic.version = 11 : i64} {
  func.func @_textcnn_kernel(%arg0: i32, %arg1: memref<192x32xf32, #tpu.memory_space<vmem>>, %arg2: memref<160x128xf32, #tpu.memory_space<vmem>>, %arg3: memref<1x128xf32, #tpu.memory_space<vmem>>, %arg4: memref<1x128xi32, #tpu.memory_space<vmem>>, %arg5: memref<128x128xf32, #tpu.memory_space<vmem>>, %arg6: memref<1x128xf32, #tpu.memory_space<vmem>>, %arg7: memref<8x128xf32, #tpu.memory_space<vmem>>) attributes {dimension_semantics = [#tpu.dimension_semantics<parallel>], iteration_bounds = array<i64: 2>, scalar_prefetch = 0 : i64, scratch_operands = 0 : i64, tpu.core_type = #tpu.core_type<tc>, window_params = [{transform_indices = @transform_0, window_bounds = array<i64: 192, 32>}, {pipeline_mode = #tpu.pipeline_mode<synchronous>, transform_indices = @transform_1, window_bounds = array<i64: 160, 128>}, {pipeline_mode = #tpu.pipeline_mode<synchronous>, transform_indices = @transform_2, window_bounds = array<i64: 1, 128>}, {pipeline_mode = #tpu.pipeline_mode<synchronous>, transform_indices = @transform_3, window_bounds = array<i64: 1, 128>}, {pipeline_mode = #tpu.pipeline_mode<synchronous>, transform_indices = @transform_4, window_bounds = array<i64: 128, 128>}, {pipeline_mode = #tpu.pipeline_mode<synchronous>, transform_indices = @transform_5, window_bounds = array<i64: 1, 128>}, {transform_indices = @transform_6, window_bounds = array<i64: 8, 128>}]} {
    %c0 = arith.constant 0 : index
    %c0_0 = arith.constant 0 : index
    %0 = vector.load %arg1[%c0, %c0_0] : memref<192x32xf32, #tpu.memory_space<vmem>>, vector<192x32xf32>
    %1 = vector.extract_strided_slice %0 {offsets = [0, 0], sizes = [184, 32], strides = [1, 1]} : vector<192x32xf32> to vector<184x32xf32>
    %2 = vector.extract_strided_slice %0 {offsets = [1, 0], sizes = [184, 32], strides = [1, 1]} : vector<192x32xf32> to vector<184x32xf32>
    %3 = vector.extract_strided_slice %0 {offsets = [2, 0], sizes = [184, 32], strides = [1, 1]} : vector<192x32xf32> to vector<184x32xf32>
    %4 = vector.extract_strided_slice %0 {offsets = [3, 0], sizes = [184, 32], strides = [1, 1]} : vector<192x32xf32> to vector<184x32xf32>
    %5 = vector.extract_strided_slice %0 {offsets = [4, 0], sizes = [184, 32], strides = [1, 1]} : vector<192x32xf32> to vector<184x32xf32>
    %6 = tpu.concatenate %1, %2, %3, %4, %5 in 1 : vector<184x32xf32>, vector<184x32xf32>, vector<184x32xf32>, vector<184x32xf32>, vector<184x32xf32> -> vector<184x160xf32>
    %c0_1 = arith.constant 0 : index
    %c0_2 = arith.constant 0 : index
    %7 = vector.load %arg2[%c0_1, %c0_2] : memref<160x128xf32, #tpu.memory_space<vmem>>, vector<160x128xf32>
    %cst = arith.constant dense<0.000000e+00> : vector<184x128xf32>
    %8 = tpu.matmul %6, %7, %cst {dimension_numbers = #tpu.dot_dimension_numbers<[1], [0], [0], [1], [0, 0, 1, 1], [], []>} : vector<184x160xf32>, vector<160x128xf32>, vector<184x128xf32> -> vector<184x128xf32>
    %c0_3 = arith.constant 0 : index
    %c0_4 = arith.constant 0 : index
    %9 = vector.load %arg3[%c0_3, %c0_4] : memref<1x128xf32, #tpu.memory_space<vmem>>, vector<1x128xf32>
    %10 = vector.broadcast %9 : vector<1x128xf32> to vector<184x128xf32>
    %11 = arith.addf %8, %10 : vector<184x128xf32>
    %cst_5 = arith.constant 0.000000e+00 : f32
    %12 = vector.broadcast %cst_5 : f32 to vector<184x128xf32>
    %13 = arith.maximumf %11, %12 : vector<184x128xf32>
    %cst_6 = arith.constant 0.000000e+00 : f32
    %14 = vector.broadcast %cst_6 : f32 to vector<8x128xf32>
    %15 = tpu.concatenate %13, %14 in 0 : vector<184x128xf32>, vector<8x128xf32> -> vector<192x128xf32>
    %16 = vector.shape_cast %15 : vector<192x128xf32> to vector<8x24x128xf32>
    %17 = tpu.iota {dimensions = array<i32: 0>} : vector<24x128xi32>
    %c0_7 = arith.constant 0 : index
    %c0_8 = arith.constant 0 : index
    %18 = vector.load %arg4[%c0_7, %c0_8] : memref<1x128xi32, #tpu.memory_space<vmem>>, vector<1x128xi32>
    %19 = vector.broadcast %18 : vector<1x128xi32> to vector<24x128xi32>
    %20 = arith.cmpi slt, %17, %19 : vector<24x128xi32>
    %21 = vector.shape_cast %20 : vector<24x128xi1> to vector<1x24x128xi1>
    %cst_9 = arith.constant 0.000000e+00 : f32
    %22 = vector.shape_cast %21 : vector<1x24x128xi1> to vector<1x24x128xi1>
    %23 = vector.broadcast %22 : vector<1x24x128xi1> to vector<8x24x128xi1>
    %24 = vector.broadcast %cst_9 : f32 to vector<8x24x128xf32>
    %25 = arith.select %23, %16, %24 : vector<8x24x128xi1>, vector<8x24x128xf32>
    %cst_10 = arith.constant dense<0xFF800000> : vector<8x128xf32>
    %26 = vector.multi_reduction <maximumf>, %25, %cst_10 [1] : vector<8x24x128xf32> to vector<8x128xf32>
    %c0_11 = arith.constant 0 : index
    %c0_12 = arith.constant 0 : index
    %27 = vector.load %arg5[%c0_11, %c0_12] : memref<128x128xf32, #tpu.memory_space<vmem>>, vector<128x128xf32>
    %cst_13 = arith.constant dense<0.000000e+00> : vector<8x128xf32>
    %28 = tpu.matmul %26, %27, %cst_13 {dimension_numbers = #tpu.dot_dimension_numbers<[1], [0], [0], [1], [0, 0, 1, 1], [], []>} : vector<8x128xf32>, vector<128x128xf32>, vector<8x128xf32> -> vector<8x128xf32>
    %c0_14 = arith.constant 0 : index
    %c0_15 = arith.constant 0 : index
    %29 = vector.load %arg6[%c0_14, %c0_15] : memref<1x128xf32, #tpu.memory_space<vmem>>, vector<1x128xf32>
    %30 = vector.broadcast %29 : vector<1x128xf32> to vector<8x128xf32>
    %31 = arith.addf %28, %30 : vector<8x128xf32>
    %c0_16 = arith.constant 0 : index
    %c0_17 = arith.constant 0 : index
    %32 = vector.load %arg7[%c0_16, %c0_17] : memref<8x128xf32, #tpu.memory_space<vmem>>, vector<8x128xf32>
    tpu.vector_store %arg7[%c0_16, %c0_17], %31 {strides = array<i32>} : memref<8x128xf32, #tpu.memory_space<vmem>>, vector<8x128xf32>,
    return
  }
  func.func @transform_0(%arg0: i32) -> (i32, i32) {
    %c0_i32 = arith.constant 0 : i32
    %c0_i32_0 = arith.constant 0 : i32
    return %arg0, %c0_i32 : i32, i32
  }
  func.func @transform_1(%arg0: i32) -> (i32, i32) {
    %c0_i32 = arith.constant 0 : i32
    %c0_i32_0 = arith.constant 0 : i32
    %c0_i32_1 = arith.constant 0 : i32
    return %c0_i32, %c0_i32_0 : i32, i32
  }
  func.func @transform_2(%arg0: i32) -> (i32, i32) {
    %c0_i32 = arith.constant 0 : i32
    %c0_i32_0 = arith.constant 0 : i32
    %c0_i32_1 = arith.constant 0 : i32
    return %c0_i32, %c0_i32_0 : i32, i32
  }
  func.func @transform_3(%arg0: i32) -> (i32, i32) {
    %c0_i32 = arith.constant 0 : i32
    %c0_i32_0 = arith.constant 0 : i32
    %c0_i32_1 = arith.constant 0 : i32
    return %c0_i32, %c0_i32_0 : i32, i32
  }
  func.func @transform_4(%arg0: i32) -> (i32, i32) {
    %c0_i32 = arith.constant 0 : i32
    %c0_i32_0 = arith.constant 0 : i32
    %c0_i32_1 = arith.constant 0 : i32
    return %c0_i32, %c0_i32_0 : i32, i32
  }
  func.func @transform_5(%arg0: i32) -> (i32, i32) {
    %c0_i32 = arith.constant 0 : i32
    %c0_i32_0 = arith.constant 0 : i32
    %c0_i32_1 = arith.constant 0 : i32
    return %c0_i32, %c0_i32_0 : i32, i32
  }
  func.func @transform_6(%arg0: i32) -> (i32, i32) {
    %c0_i32 = arith.constant 0 : i32
    %c0_i32_0 = arith.constant 0 : i32
    return %arg0, %c0_i32 : i32, i32
  }
}

</mosaic_0001>

<bundles_post_ra>
// kernel: tpu_custom_call.1
= control target key start
LH: loop header
LB: loop body
LE: loop exit
PB: predicated region body
PF: predicated region fallthrough
CT: control target
= control target key end

     0   :  { %11 = vsyncpa [#allocation3], 0  ;;  %s2649_s0 = inlined_call_operand.vmem [shape: f32[384,32], index: 0, kind: input, shape index: {}]   ;;  %s2650_s1 = inlined_call_operand.vmem [shape: f32[160,128], index: 1, kind: input, shape index: {}]   ;;  %s2651_s2 = inlined_call_operand.vmem [shape: f32[1,128], index: 2, kind: input, shape index: {}]   ;;  %s2652_s3 = inlined_call_operand.vmem [shape: s32[1,128], index: 3, kind: input, shape index: {}]   ;;  %s2653_s4 = inlined_call_operand.vmem [shape: f32[128,128], index: 4, kind: input, shape index: {}]   ;;  %s2654_s5 = inlined_call_operand.vmem [shape: f32[1,128], index: 5, kind: input, shape index: {}]   ;;  %s2655_s6 = inlined_call_operand.hbm [shape: f32[16,128], index: 6, kind: output, shape index: {}]  }
   0x1   :  { %13 = vsyncpa [#allocation3 + $0x1], 0  ;;  %s1820_s21 = smov 0   ;;  %s1822_s22 = smov 0  }
   0x2   :  { %s1824_s23 = smov 0   ;;  %s1826_s24 = smov 0  }
   0x3 LB: > { %s1841_s25 = sadd.s32 4294967295, %s1776_s24   ;;  %s1342_s26 = sadd.s32 4294967294, %s1776_s24   ;;  %s1776_s24 = sphi %s1826_s24, %s2667_s24   ;;  %s1772_s23 = sphi %s1824_s23, %s2666_s23   ;;  %s1768_s22 = sphi %s1822_s22, %s2665_s22   ;;  %s1764_s21 = sphi %s1820_s21, %s2664_s21  }
   0x4   : > { %s1845_s27 = sadd.s32 1, %s1776_s24   ;;  %s157_s28 = sadd.s32 1, %s1772_s23 }
   0x5   : > { %s154_s29 = ssub.s32 %s1776_s24, %s1845_s27  ;;  %p167_p0 = scmp.ne.s32.totalorder %s1772_s23, %s1768_s22 }
   0x6   : > { %p155_p1 = scmp.eq.s32.totalorder %s154_s29, 0  ;;  %p168_p2 = scmp.eq.s32.totalorder %s1841_s25, 1 }
   0x7   : > { %p173_p3 = scmp.ne.s32.totalorder %s1768_s22, %s1764_s21  ;;  %p174_p4 = scmp.eq.s32.totalorder %s1342_s26, 1 }
   0x8   : > { %s1856_s30 = scalar_select %p155_p1, %s1772_s23, %s157_s28  }
   0x9   : > { %p1858_p5 = por %p168_p2, %p167_p0  ;;  %p1862_p6 = por %p174_p4, %p173_p3 }
   0xa   : > { %p1345_p7 = scmp.ge.s32.totalorder %s1776_s24, 1  ;;  %p216_p8 = scmp.lt.s32.totalorder %s1776_s24, 3 }
   0xc   : > { %p217_p9 = pnand %p1345_p7, %p216_p8 }
   0xd   : > { %s246_s9 = smul.u32 (!%p217_p9), 24, %s1841_s25  ;;  %v1778_v0 = vmov (!%p217_p9), 0.0|0.0   ;;  %v771_v1 = vld [vmem:[%s2650_s1] sm:$0xff] (!%p217_p9)  ;;  %v772_v2 = vld [vmem:[%s2650_s1 + $0x8] sm:$0xff] (!%p217_p9)  ;;  %v773_v3 = vld [vmem:[%s2650_s1 + $0x10] sm:$0xff] (!%p217_p9)  ;;  %vm300_vm0 = vcmask (!%p217_p9), 1046528  }
   0xe   : > { %220 = sbr.rel (%p217_p9) target bundleno = 678 (0x2a6), region = 44  ;;  %1430 = vmatprep.subr.bf16.mxu0 (!%p217_p9), %v1778_v0  ;;  %1484 = vmatprep.subr.bf16.mxu1 (!%p217_p9), %v1778_v0  ;;  %v1431_v4 = vpack.c.bf16 (!%p217_p9), %v772_v2, %v771_v1  ;;  %v774_v5 = vld [vmem:[%s2650_s1 + $0x18] sm:$0xff] (!%p217_p9)  ;;  %v775_v7 = vld [vmem:[%s2650_s1 + $0x20] sm:$0xff] (!%p217_p9)  ;;  %v776_v8 = vld [vmem:[%s2650_s1 + $0x28] sm:$0xff] (!%p217_p9)  ;;  %vm534_vm1 = vcmask (!%p217_p9), 1044480   ;;  %vm417_vm2 = vcmask (!%p217_p9), 1045504  }
   0xf   : > { %p247_p10 = scmp.lt.s32.totalorder (!%p217_p9), %s246_s9, 47  ;;  %v1434_v6 = vpack.c.bf16 (!%p217_p9), %v774_v5, %v773_v3  ;;  %v777_v9 = vld [vmem:[%s2650_s1 + $0x30] sm:$0xff] (!%p217_p9)  ;;  %v778_v10 = vld [vmem:[%s2650_s1 + $0x38] sm:$0xff] (!%p217_p9)  ;;  %v779_v11 = vld [vmem:[%s2650_s1 + $0x40] sm:$0xff] (!%p217_p9)  ;;  %v1437_v16 = vpack.c.bf16 (!%p217_p9), %v776_v8, %v775_v7  ;;  %s1780_s20 = smov (!%p217_p9), 96   ;;  %vm651_vm3 = vcmask (!%p217_p9), 1043456  }
  0x10   : > { %1432 = vmatpush1.bf16.msra.mxu0 (!%p217_p9), %v1431_v4  ;;  %1494 = vmatpush1.bf16.msra.mxu1 (!%p217_p9), %v1431_v4  ;;  %v780_v12 = vld [vmem:[%s2650_s1 + $0x48] sm:$0xff] (!%p217_p9)  ;;  %v1917_v17 = vpack.c.bf16 (!%p217_p9), %v778_v10, %v777_v9  ;;  %v781_v56 = vld [vmem:[%s2650_s1 + $0x50] sm:$0xff] (!%p217_p9)  ;;  %v782_v63 = vld [vmem:[%s2650_s1 + $0x58] sm:$0xff] (!%p217_p9)  ;;  %s1781_s11 = smov (!%p217_p9), 64   ;;  %vm699_vm4 = vcmask (!%p217_p9), 261120   ;;  %vm723_vm5 = vcmask (!%p217_p9), 523264  }
  0x11   : > { %1433 = vmatprep.subr.bf16.mxu0 (!%p217_p9), %v1778_v0  ;;  %1485 = vmatprep.subr.bf16.mxu1 (!%p217_p9), %v1778_v0  ;;  %v1919_v18 = vpack.c.bf16 (!%p217_p9), %v780_v12, %v779_v11  ;;  %v1446_v11 = vpack.c.bf16 (!%p217_p9), %v782_v63, %v781_v56  ;;  %vm747_vm6 = vcmask (!%p217_p9), 785408   ;;  %vm1782_vm7 = vmmov (!%p217_p9), 0   ;;  %s243_s26 = sand.u32 (!%p217_p9), 1, %s1768_s22   ;;  %s1375_s12 = sshll.u32 (!%p217_p9), %s1841_s25, 7 }
  0x12   : > { %vm1183_vm11 = vcmask (!%p217_p9), 1041409   ;;  %vm1185_vm12 = vcmask (!%p217_p9), 1042434   ;;  %vm1187_vm13 = vcmask (!%p217_p9), 1043459   ;;  %vm1189_vm14 = vcmask (!%p217_p9), 1044484   ;;  %s1346_s28 = sshll.u32 (!%p217_p9), %s243_s26, 3  ;;  %s1784_s25 = smov (!%p217_p9), [#allocation2]  }
  0x13   : > { %vm1191_vm15 = vcmask (!%p217_p9), 1045509   ;;  %s245_s13 = scalar_lea.vmem (!%p217_p9), [#allocation2], %s1346_s28 }
  0x14   : > { %1435 = vmatpush1.bf16.msra.mxu0 (!%p217_p9), %v1434_v6  ;;  %1495 = vmatpush1.bf16.msra.mxu1 (!%p217_p9), %v1434_v6  ;;  %s1283_s14 = sshll.u32 (!%p217_p9), %s245_s13, 4  ;;  %s2609_s14 = int_to_ptr.vmem [resolvable:$true] %s1283_s14 }
  0x15   : > { %s2669_s9 = smov (!%p247_p10, %s246_s9), 47  ;;  %1436 = vmatprep.subr.bf16.mxu0 %v1778_v0  ;;  %1486 = vmatprep.subr.bf16.mxu1 %v1778_v0 }
  0x16   : > { %s1347_s16 = sshll.u32 %s2669_s9, 3  ;;  %s1779_s9 = smov 32  }
  0x17   : > { %s1906_s19 = scalar_lea.vmem %s2649_s0, %s1347_s16 }
  0x18   : > { %v1909_v13 = vld [vmem:[%s1906_s19] sm:$0xff]  ;;  %v1912_v14 = vld [vmem:[%s1906_s19 + $0x8] sm:$0xff]  ;;  %v1915_v15 = vld [vmem:[%s1906_s19 + $0x10] sm:$0xff]  ;;  %1438 = vmatpush1.bf16.msra.mxu0 %v1437_v16  ;;  %1496 = vmatpush1.bf16.msra.mxu1 %v1437_v16 }
  0x19   : > { %v301_v19 = vrot.slane %v1909_v13, 1  ;;  %v302_v20 = vrot.slane %v1912_v14, 1  ;;  %v304_v21 = vrot.slane %v1915_v15, 1  ;;  %v535_v22 = vrot.slane %v1909_v13, 3  ;;  %v1926_v23 = vld [vmem:[%s1906_s19 + $0x18] sm:$0xff]  ;;  %v1935_v28 = vld [vmem:[%s1906_s19 + $0x60] sm:$0xff]  ;;  %1439 = vmatprep.subr.bf16.mxu0 %v1778_v0  ;;  %1487 = vmatprep.subr.bf16.mxu1 %v1778_v0 }
  0x1a   : > { %v536_v24 = vrot.slane %v1912_v14, 3  ;;  %v538_v25 = vrot.slane %v1915_v15, 3  ;;  %v418_v26 = vrot.slane %v1909_v13, 2  ;;  %v419_v27 = vrot.slane %v1912_v14, 2  ;;  %v1941_v32 = vld [vmem:[%s1906_s19 + $0x68] sm:$0xff]  ;;  %v1951_v42 = vld [vmem:[%s1906_s19 + $0x20] sm:$0xff] }
  0x1b   : > { %v303_v29 = vsel %vm300_vm0, %v301_v19, %v302_v20  ;;  %v305_v30 = vsel %vm300_vm0, %v302_v20, %v304_v21  ;;  %v421_v31 = vrot.slane %v1915_v15, 2  ;;  %v306_v33 = vrot.slane %v1926_v23, 1  ;;  %v1954_v43 = vld [vmem:[%s1906_s19 + $0x70] sm:$0xff]  ;;  %v1985_v61 = vld [vmem:[%s1906_s19 + $0x28] sm:$0xff]  ;;  %v1988_v62 = vld [vmem:[%s1906_s19 + $0x78] sm:$0xff] }
  0x1c   : > { %v1549_v34 = vpack.i.bf16 %v305_v30, %v303_v29  ;;  %v537_v35 = vsel %vm534_vm1, %v535_v22, %v536_v24  ;;  %v539_v36 = vsel %vm534_vm1, %v536_v24, %v538_v25  ;;  %v420_v37 = vsel %vm417_vm2, %v418_v26, %v419_v27  ;;  %1441 = vmatpush1.bf16.msra.mxu0 %v1917_v17  ;;  %v2016_v24 = vld [vmem:[%s1906_s19 + $0x30] sm:$0xff]  ;;  %v784_v26 = vld [vmem:[%s2650_s1 + $0x68] sm:$0xff]  ;;  %v2026_v29 = vld [vmem:[%s1906_s19 + $0x80] sm:$0xff] }
  0x1d   : > { %v1559_v38 = vpack.i.bf16 %v539_v36, %v537_v35  ;;  %v422_v39 = vsel %vm417_vm2, %v419_v27, %v421_v31  ;;  %v307_v40 = vsel %vm300_vm0, %v304_v21, %v306_v33  ;;  %v324_v41 = vrot.slane %v1935_v28, 1  ;;  %1442 = vmatprep.subr.bf16.mxu0 %v1778_v0  ;;  %1497 = vmatpush1.bf16.msra.mxu1 %v1917_v17 }
  0x1e   : > { %1550 = vrot.lane.b32.xlu0 %v1549_v34, %s1779_s9  ;;  %v1554_v44 = vpack.i.bf16 %v422_v39, %v420_v37  ;;  %v326_v45 = vrot.slane %v1941_v32, 1  ;;  %v423_v46 = vrot.slane %v1926_v23, 2  ;;  %v441_v47 = vrot.slane %v1935_v28, 2  ;;  %1488 = vmatprep.subr.bf16.mxu1 %v1778_v0 }
  0x1f   : > { %1560 = vrot.lane.b32.xlu1 %v1559_v38, %s1780_s20  ;;  %v443_v48 = vrot.slane %v1941_v32, 2  ;;  %v540_v49 = vrot.slane %v1926_v23, 3  ;;  %v558_v50 = vrot.slane %v1935_v28, 3  ;;  %v560_v51 = vrot.slane %v1941_v32, 3 }
  0x20   : > { %v327_v52 = vsel %vm300_vm0, %v324_v41, %v326_v45  ;;  %v424_v53 = vsel %vm417_vm2, %v421_v31, %v423_v46  ;;  %v308_v54 = vrot.slane %v1951_v42, 1  ;;  %v328_v55 = vrot.slane %v1954_v43, 1  ;;  %1444 = vmatpush1.bf16.msra.mxu0 %v1919_v18 }
  0x21   : > { %v1564_v57 = vpack.i.bf16 %v307_v40, %v327_v52  ;;  %v444_v58 = vsel %vm417_vm2, %v441_v47, %v443_v48  ;;  %v541_v59 = vsel %vm534_vm1, %v538_v25, %v540_v49  ;;  %v561_v60 = vsel %vm534_vm1, %v558_v50, %v560_v51  ;;  %1445 = vmatprep.subr.bf16.mxu0 %v1778_v0  ;;  %v783_v25 = vld [vmem:[%s2650_s1 + $0x60] sm:$0xff]  ;;  %v2052_v52 = vld [vmem:[%s1906_s19 + $0x38] sm:$0xff] }
  0x22   : > { %1555 = vrot.lane.b32.xlu0 %v1554_v44, %s1781_s11  ;;  %v1569_v1 = vpack.i.bf16 %v424_v53, %v444_v58  ;;  %v1574_v2 = vpack.i.bf16 %v541_v59, %v561_v60  ;;  %v309_v3 = vsel %vm300_vm0, %v306_v33, %v308_v54  ;;  %v329_v4 = vsel %vm300_vm0, %v326_v45, %v328_v55  ;;  %v785_v45 = vld [vmem:[%s2650_s1 + $0x70] sm:$0xff]  ;;  %v2055_v53 = vld [vmem:[%s1906_s19 + $0x88] sm:$0xff] }
  0x23   : > { %1565 = vrot.lane.b32.xlu1 %v1564_v57, %s1779_s9  ;;  %v425_v5 = vrot.slane %v1951_v42, 2  ;;  %v445_v6 = vrot.slane %v1954_v43, 2  ;;  %v542_v7 = vrot.slane %v1951_v42, 3  ;;  %v562_v8 = vrot.slane %v1954_v43, 3  ;;  %1498 = vmatpush1.bf16.msra.mxu1 %v1919_v18 }
  0x24   : > { %v310_v9 = vrot.slane %v1985_v61, 1  ;;  %v330_v10 = vrot.slane %v1988_v62, 1  ;;  %v427_v19 = vrot.slane %v1985_v61, 2  ;;  %v1579_v17 = vpack.i.bf16 %v309_v3, %v329_v4  ;;  %1447 = vmatpush1.bf16.msra.mxu0 %v1446_v11  ;;  %1489 = vmatprep.subr.bf16.mxu1 %v1778_v0 }
  0x25   : > { %v426_v12 = vsel %vm417_vm2, %v423_v46, %v425_v5  ;;  %v446_v16 = vsel %vm417_vm2, %v443_v48, %v445_v6  ;;  %v543_v20 = vsel %vm534_vm1, %v540_v49, %v542_v7  ;;  %v563_v21 = vsel %vm534_vm1, %v560_v51, %v562_v8  ;;  %1448 = vmatprep.subr.bf16.mxu0 %v1778_v0  ;;  %v786_v46 = vld [vmem:[%s2650_s1 + $0x78] sm:$0xff] }
  0x26   : > { %1570 = vrot.lane.b32.xlu0 %v1569_v1, %s1781_s11  ;;  %v447_v22 = vrot.slane %v1988_v62, 2  ;;  %v1584_v27 = vpack.i.bf16 %v426_v12, %v446_v16  ;;  %v311_v30 = vsel %vm300_vm0, %v308_v54, %v310_v9  ;;  %v331_v31 = vsel %vm300_vm0, %v328_v55, %v330_v10  ;;  %v787_v1 = vld [vmem:[%s2650_s1 + $0x80] sm:$0xff] }
  0x27   : > { %1575 = vrot.lane.b32.xlu1 %v1574_v2, %s1780_s20  ;;  %v544_v33 = vrot.slane %v1985_v61, 3  ;;  %v564_v34 = vrot.slane %v1988_v62, 3  ;;  %v1589_v35 = vpack.i.bf16 %v543_v20, %v563_v21  ;;  %v428_v36 = vsel %vm417_vm2, %v425_v5, %v427_v19  ;;  %1499 = vmatpush1.bf16.msra.mxu1 %v1446_v11  ;;  %v788_v2 = vld [vmem:[%s2650_s1 + $0x88] sm:$0xff]  ;;  %v2081_v16 = vld [vmem:[%s1906_s19 + $0x40] sm:$0xff] }
  0x28   : > { %v312_v37 = vrot.slane %v2016_v24, 1  ;;  %v1449_v38 = vpack.c.bf16 %v784_v26, %v783_v25  ;;  %v448_v39 = vsel %vm417_vm2, %v445_v6, %v447_v22  ;;  %v332_v40 = vrot.slane %v2026_v29, 1  ;;  %1490 = vmatprep.subr.bf16.mxu1 %v1778_v0  ;;  %v2096_v26 = vld [vmem:[%s1906_s19 + $0x90] sm:$0xff] }
  0x29   : > { %v429_v18 = vrot.slane %v2016_v24, 2  ;;  %v449_v44 = vrot.slane %v2026_v29, 2  ;;  %v1594_v48 = vpack.i.bf16 %v311_v30, %v331_v31  ;;  %v545_v49 = vsel %vm534_vm1, %v542_v7, %v544_v33  ;;  %v2101_v31 = vld [vmem:[%s1906_s19 + $0x48] sm:$0xff] }
  0x2a   : > { %1580 = vrot.lane.b32.xlu0 %v1579_v17, %s1779_s9  ;;  %v565_v51 = vsel %vm534_vm1, %v562_v8, %v564_v34  ;;  %v1599_v54 = vpack.i.bf16 %v428_v36, %v448_v39  ;;  %v313_v55 = vsel %vm300_vm0, %v310_v9, %v312_v37  ;;  %v546_v56 = vrot.slane %v2016_v24, 3  ;;  %1450 = vmatpush1.bf16.msra.mxu0 %v1449_v38  ;;  %v790_v17 = vld [vmem:[%s2650_s1 + $0x98] sm:$0xff] }
  0x2b   : > { %1585 = vrot.lane.b32.xlu1 %v1584_v27, %s1781_s11  ;;  %v1452_v57 = vpack.c.bf16 %v786_v46, %v785_v45  ;;  %v333_v58 = vsel %vm300_vm0, %v330_v10, %v332_v40  ;;  %v430_v59 = vsel %vm417_vm2, %v427_v19, %v429_v18  ;;  %v450_v60 = vsel %vm417_vm2, %v447_v22, %v449_v44  ;;  %v789_v19 = vld [vmem:[%s2650_s1 + $0x90] sm:$0xff] }
  0x2c   : > { %v566_v63 = vrot.slane %v2026_v29, 3  ;;  %1451 = vmatprep.subr.bf16.mxu0 %v1778_v0  ;;  %v1604_v3 = vpack.i.bf16 %v545_v49, %v565_v51  ;;  %v314_v4 = vrot.slane %v2052_v52, 1  ;;  %v334_v5 = vrot.slane %v2055_v53, 1  ;;  %1500 = vmatpush1.bf16.msra.mxu1 %v1449_v38 }
  0x2d   : > { %v1609_v6 = vpack.i.bf16 %v313_v55, %v333_v58  ;;  %v1614_v7 = vpack.i.bf16 %v430_v59, %v450_v60  ;;  %v1455_v8 = vpack.c.bf16 %v788_v2, %v787_v1  ;;  %v547_v9 = vsel %vm534_vm1, %v544_v33, %v546_v56  ;;  %1491 = vmatprep.subr.bf16.mxu1 %v1778_v0  ;;  %v2104_v33 = vld [vmem:[%s1906_s19 + $0x98] sm:$0xff] }
  0x2e   : > { %1590 = vrot.lane.b32.xlu0 %v1589_v35, %s1780_s20  ;;  %1453 = vmatpush1.bf16.msra.mxu0 %v1452_v57  ;;  %v567_v10 = vsel %vm534_vm1, %v564_v34, %v566_v63  ;;  %v431_v11 = vrot.slane %v2052_v52, 2  ;;  %v451_v12 = vrot.slane %v2055_v53, 2  ;;  %v315_v20 = vsel %vm300_vm0, %v312_v37, %v314_v4 }
  0x2f   : > { %1595 = vrot.lane.b32.xlu1 %v1594_v48, %s1779_s9  ;;  %v335_v21 = vsel %vm300_vm0, %v332_v40, %v334_v5  ;;  %v548_v22 = vrot.slane %v2052_v52, 3  ;;  %v568_v25 = vrot.slane %v2055_v53, 3  ;;  %1454 = vmatprep.subr.bf16.mxu0 %v1778_v0  ;;  %v1619_v27 = vpack.i.bf16 %v547_v9, %v567_v10  ;;  %v2152_v10 = vld [vmem:[%s1906_s19 + $0xb0] sm:$0xff] }
  0x30   : > { %1501 = vmatpush1.bf16.msra.mxu1 %v1452_v57  ;;  %v316_v30 = vrot.slane %v2081_v16, 1  ;;  %v1458_v34 = vpack.c.bf16 %v790_v17, %v789_v19  ;;  %v1624_v35 = vpack.i.bf16 %v315_v20, %v335_v21  ;;  %v432_v36 = vsel %vm417_vm2, %v429_v18, %v431_v11  ;;  %v2157_v20 = vld [vmem:[%s1906_s19 + $0xb8] sm:$0xff] }
  0x31   : > { %v452_v37 = vsel %vm417_vm2, %v449_v44, %v451_v12  ;;  %v336_v38 = vrot.slane %v2096_v26, 1  ;;  %v549_v39 = vsel %vm534_vm1, %v546_v56, %v548_v22  ;;  %v569_v40 = vsel %vm534_vm1, %v566_v63, %v568_v25  ;;  %1492 = vmatprep.subr.bf16.mxu1 %v1778_v0 }
  0x32   : > { %1600 = vrot.lane.b32.xlu0 %v1599_v54, %s1781_s11  ;;  %1456 = vmatpush1.bf16.msra.mxu0 %v1455_v8  ;;  %v433_v45 = vrot.slane %v2081_v16, 2  ;;  %v453_v46 = vrot.slane %v2096_v26, 2  ;;  %v550_v48 = vrot.slane %v2081_v16, 3  ;;  %v570_v18 = vrot.slane %v2096_v26, 3 }
  0x33   : > { %1605 = vrot.lane.b32.xlu1 %v1604_v3, %s1780_s20  ;;  %v318_v44 = vrot.slane %v2101_v31, 1  ;;  %v338_v49 = vrot.slane %v2104_v33, 1  ;;  %1457 = vmatprep.subr.bf16.mxu0 %v1778_v0  ;;  %v435_v51 = vrot.slane %v2101_v31, 2  ;;  %v455_v54 = vrot.slane %v2104_v33, 2 }
  0x34   : > { %1502 = vmatpush1.bf16.msra.mxu1 %v1455_v8  ;;  %v1629_v55 = vpack.i.bf16 %v432_v36, %v452_v37  ;;  %v1634_v56 = vpack.i.bf16 %v549_v39, %v569_v40  ;;  %v317_v57 = vsel %vm300_vm0, %v314_v4, %v316_v30  ;;  %v337_v58 = vsel %vm300_vm0, %v334_v5, %v336_v38  ;;  %v2147_v8 = vld [vmem:[%s1906_s19 + $0xa0] sm:$0xff] }
  0x35   : > { %1493 = vmatprep.subr.bf16.mxu1 %v1778_v0  ;;  %v434_v59 = vsel %vm417_vm2, %v431_v11, %v433_v45  ;;  %v454_v60 = vsel %vm417_vm2, %v451_v12, %v453_v46  ;;  %v551_v63 = vsel %vm534_vm1, %v548_v22, %v550_v48  ;;  %v571_v1 = vsel %vm534_vm1, %v568_v25, %v570_v18 }
  0x36   : > { %1610 = vrot.lane.b32.xlu0 %v1609_v6, %s1779_s9  ;;  %1459 = vmatpush1.bf16.msra.mxu0 %v1458_v34  ;;  %v319_v2 = vsel %vm300_vm0, %v316_v30, %v318_v44  ;;  %v339_v3 = vsel %vm300_vm0, %v336_v38, %v338_v49  ;;  %v436_v4 = vsel %vm417_vm2, %v433_v45, %v435_v51  ;;  %v552_v6 = vrot.slane %v2101_v31, 3 }
  0x37   : > { %1615 = vrot.lane.b32.xlu1 %v1614_v7, %s1781_s11  ;;  %v456_v5 = vsel %vm417_vm2, %v453_v46, %v455_v54  ;;  %v2144_v7 = vld [vmem:[%s1906_s19 + $0x50] sm:$0xff]  ;;  %v1639_v9 = vpack.i.bf16 %v317_v57, %v337_v58  ;;  %v1644_v11 = vpack.i.bf16 %v434_v59, %v454_v60  ;;  %v1649_v12 = vpack.i.bf16 %v551_v63, %v571_v1  ;;  %v2194_v60 = vld [vmem:[%s1906_s19 + $0xa8] sm:$0xff] }
  0x38   : > { %1503 = vmatpush1.bf16.msra.mxu1 %v1458_v34  ;;  %v1654_v19 = vpack.i.bf16 %v319_v2, %v339_v3  ;;  %v572_v17 = vrot.slane %v2104_v33, 3  ;;  %v1659_v21 = vpack.i.bf16 %v436_v4, %v456_v5  ;;  %v320_v22 = vrot.slane %v2144_v7, 1 }
  0x39   : > { %1460 = vmatprep.subr.bf16.mxu1 %v1778_v0  ;;  %v340_v25 = vrot.slane %v2147_v8, 1  ;;  %v553_v30 = vsel %vm534_vm1, %v550_v48, %v552_v6  ;;  %v457_v34 = vrot.slane %v2147_v8, 2  ;;  %v461_v36 = vrot.slane %v2152_v10, 2 }
  0x3a   : > { %1620 = vrot.lane.b32.xlu0 %v1619_v27, %s1780_s20  ;;  %v437_v27 = vrot.slane %v2144_v7, 2  ;;  %v346_v37 = vrot.slane %v2157_v20, 1  ;;  %v463_v38 = vrot.slane %v2157_v20, 2  ;;  %v580_v39 = vrot.slane %v2157_v20, 3 }
  0x3b   : > { %1625 = vrot.lane.b32.xlu1 %v1624_v35, %s1779_s9  ;;  %v344_v35 = vrot.slane %v2152_v10, 1  ;;  %v652_v40 = vrot.slane %v1909_v13, 4  ;;  %v573_v45 = vsel %vm534_vm1, %v570_v18, %v572_v17  ;;  %v578_v46 = vrot.slane %v2152_v10, 3  ;;  %v2191_v18 = vld [vmem:[%s1906_s19 + $0x58] sm:$0xff]  ;;  %s2607_s19 = scalar_lea.hbm %s2655_s6, %s1375_s12 }
  0x3c   : > { %v653_v48 = vrot.slane %v1912_v14, 4  ;;  %v554_v57 = vrot.slane %v2144_v7, 3  ;;  %v2188_v59 = vsel %vm417_vm2, %v461_v36, %v463_v38  ;;  %v677_v1 = vrot.slane %v1941_v32, 4 }
  0x3d   : > { %v2183_v58 = vsel %vm300_vm0, %v344_v35, %v346_v37  ;;  %v655_v2 = vrot.slane %v1915_v15, 4  ;;  %v1664_v3 = vpack.i.bf16 %v553_v30, %v573_v45  ;;  %v341_v4 = vsel %vm300_vm0, %v338_v49, %v340_v25 }
  0x3e   : > { %1630 = vrot.lane.b32.xlu0 %v1629_v55, %s1781_s11  ;;  %v675_v55 = vrot.slane %v1935_v28, 4  ;;  %v654_v63 = vsel %vm651_vm3, %v652_v40, %v653_v48  ;;  %v574_v5 = vrot.slane %v2147_v8, 3  ;;  %v322_v37 = vrot.slane %v2191_v18, 1 }
  0x3f   : > { %1635 = vrot.lane.b32.xlu1 %v1634_v56, %s1780_s20  ;;  %v321_v56 = vsel %vm300_vm0, %v318_v44, %v320_v22  ;;  %v2199_v44 = vsel %vm534_vm1, %v578_v46, %v580_v39  ;;  %1349 = vmatprep.mubr.msk.f32.mxu0 %vm699_vm4, %v654_v63  ;;  %v2222_v49 = vsel %vm651_vm3, %v653_v48, %v655_v2  ;;  %v342_v38 = vrot.slane %v2194_v60, 1 }
  0x40   : > { %v678_v30 = vsel %vm651_vm3, %v675_v55, %v677_v1  ;;  %v555_v39 = vsel %vm534_vm1, %v552_v6, %v554_v57  ;;  %v575_v40 = vsel %vm534_vm1, %v572_v17, %v574_v5  ;;  %v439_v45 = vrot.slane %v2191_v18, 2 }
  0x41   : > { %1361 = vmatprep.mubr.msk.f32.mxu1 %vm699_vm4, %v678_v30  ;;  %v459_v48 = vrot.slane %v2194_v60, 2  ;;  %v323_v63 = vsel %vm300_vm0, %v320_v22, %v322_v37 }
  0x42   : > { %1640 = vrot.lane.b32.xlu0 %v1639_v9, %s1779_s9  ;;  %v679_v9 = vrot.slane %v1954_v43, 4  ;;  %v440_v17 = vsel %vm417_vm2, %v437_v27, %v439_v45 }
  0x43   : > { %1645 = vrot.lane.b32.xlu1 %v1644_v11, %s1781_s11  ;;  %v438_v11 = vsel %vm417_vm2, %v435_v51, %v437_v27  ;;  %v325_v27 = vsel %vm300_vm0, %v322_v37, %v324_v41 }
  0x44   : > { %v2230_v51 = vsel %vm651_vm3, %v677_v1, %v679_v9  ;;  %v343_v1 = vsel %vm300_vm0, %v340_v25, %v342_v38  ;;  %v673_v25 = vrot.slane %v2191_v18, 4 }
  0x45   : > { %v1684_v6 = vpack.i.bf16 %v323_v63, %v343_v1 }
  0x46   : > { %1650 = vrot.lane.b32.xlu0 %v1649_v12, %s1780_s20  ;;  %v458_v12 = vsel %vm417_vm2, %v455_v54, %v457_v34  ;;  %v1669_v54 = vpack.i.bf16 %v321_v56, %v341_v4  ;;  %v576_v56 = vrot.slane %v2194_v60, 3  ;;  %v460_v4 = vsel %vm417_vm2, %v457_v34, %v459_v48 }
  0x47   : > { %1655 = vrot.lane.b32.xlu1 %v1654_v19, %s1779_s9  ;;  %v1674_v19 = vpack.i.bf16 %v438_v11, %v458_v12  ;;  %v1689_v12 = vpack.i.bf16 %v440_v17, %v460_v4  ;;  %v2255_v30 = vsel %vm651_vm3, %v673_v25, %v675_v55  ;;  %v345_v34 = vsel %vm300_vm0, %v342_v38, %v344_v35 }
  0x48   : > { %v577_v22 = vsel %vm534_vm1, %v574_v5, %v576_v56  ;;  %v462_v55 = vsel %vm417_vm2, %v459_v48, %v461_v36  ;;  %v695_v5 = vrot.slane %v2152_v10, 4  ;;  %v579_v36 = vsel %vm534_vm1, %v576_v56, %v578_v46 }
  0x49   : > { %vm1193_vm0 = vcmask 1046534  }
  0x4a   : > { %1660 = vrot.lane.b32.xlu0 %v1659_v21, %s1781_s11  ;;  %v556_v21 = vrot.slane %v2191_v18, 3 }
  0x4b   : > { %1665 = vrot.lane.b32.xlu1 %v1664_v3, %s1780_s20  ;;  %v1679_v3 = vpack.i.bf16 %v555_v39, %v575_v40  ;;  %v1699_v39 = vpack.i.bf16 %v325_v27, %v345_v34 }
  0x4c   : > { %v557_v11 = vsel %vm534_vm1, %v554_v57, %v556_v21  ;;  %v442_v57 = vsel %vm417_vm2, %v439_v45, %v441_v47  ;;  %v559_v47 = vsel %vm534_vm1, %v556_v21, %v558_v50  ;;  %vm1195_vm1 = vcmask 1047559  }
  0x4d   : > { %v1704_v35 = vpack.i.bf16 %v442_v57, %v462_v55 }
  0x4e   : > { %1670 = vrot.lane.b32.xlu0 %v1669_v54, %s1779_s9  ;;  %v1694_v54 = vpack.i.bf16 %v557_v11, %v577_v22 }
  0x4f   : > { %1675 = vrot.lane.b32.xlu1 %v1674_v19, %s1781_s11  ;;  %v697_v19 = vrot.slane %v2157_v20, 4  ;;  %v1709_v20 = vpack.i.bf16 %v559_v47, %v579_v36 }
  0x51   : > { %v2276_v41 = vsel %vm651_vm3, %v695_v5, %v697_v19 }
  0x52   : > { %1680 = vrot.lane.b32.xlu0 %v1679_v3, %s1780_s20 }
  0x53   : > { %1685 = vrot.lane.b32.xlu1 %v1684_v6, %s1779_s9 }
  0x56   : > { %1690 = vrot.lane.b32.xlu0 %v1689_v12, %s1781_s11 }
  0x57   : > { %1695 = vrot.lane.b32.xlu1 %v1694_v54, %s1780_s20 }
  0x5a   : > { %1700 = vrot.lane.b32.xlu0 %v1699_v39, %s1779_s9 }
  0x5b   : > { %1705 = vrot.lane.b32.xlu1 %v1704_v35, %s1781_s11 }
  0x5e   : > { %1710 = vrot.lane.b32.xlu0 %v1709_v20, %s1780_s20 }
  0x5f   : > { %392 = vrot.lane.b32.xlu1 %v2183_v58, %s1779_s9  ;;  %s1270_s9 = scalar_lea.sflag [#allocation3], %s243_s26 }
  0x62   : > { %509 = vrot.lane.b32.xlu0 %v2188_v59, %s1781_s11  ;;  %s1718_s11 = sshll.u32 %s1784_s25, 4  ;;  %s1719_s11 = int_to_ptr.vmem [resolvable:$false] %s1718_s11 }
  0x63   : > { %626 = vrot.lane.b32.xlu1 %v2199_v44, %s1780_s20  ;;  %v657_v44 = vrot.slane %v1926_v23, 4  ;;  %s1714_s20 = scalar_lea.vmem %s2609_s14, 128  ;;  %s1720_s17 = scalar_lea.vmem %s1719_s11, 256 }
  0x64   : > { %p1715_p11 = scmp.ne.s32.totalorder %s2609_s14, %s1714_s20  ;;  %p1721_p0 = scmp.lt.s32.totalorder %s2609_s14, %s1719_s11 }
  0x65   : > { %p1722_p1 = scmp.lt.s32.totalorder %s1720_s17, %s1714_s20 }
  0x66   : > { %p1716_p12 = pnand %p1715_p11, %p1858_p5 }
  0x67   : > { %p1723_p2 = por %p1722_p1, %p1721_p0 }
  0x68   : > { %p1717_p13 = pneg %p1716_p12 }
  0x6a   : > { %p1724_p3 = pnand %p1723_p2, %p1717_p13 }
  0x90   : > { %v1551_v50 = vpop.permute.xlu0 %1550 }
  0x91   : > { %v1561_v37 = vpop.permute.xlu1 %1560  ;;  %v1552_v38 = vunpack.i.l.bf16 %v1551_v50  ;;  %v1553_v46 = vunpack.i.h.bf16 %v1551_v50  ;;  %v681_v50 = vrot.slane %v1988_v62, 4 }
  0x92   : > { %v1562_v1 = vunpack.i.l.bf16 %v1561_v37 }
  0x93   : > { %v700_v58 = vsel %vm699_vm4, %v1909_v13, %v1552_v38  ;;  %v701_v17 = vsel %vm699_vm4, %v1912_v14, %v1553_v46  ;;  %v1563_v13 = vunpack.i.h.bf16 %v1561_v37  ;;  %v658_v14 = vsel %vm651_vm3, %v655_v2, %v657_v44 }
  0x94   : > { %v1556_v40 = vpop.permute.xlu0 %1555 }
  0x95   : > { %v1558_v45 = vunpack.i.h.bf16 %v1556_v40  ;;  %v1557_v48 = vunpack.i.l.bf16 %v1556_v40  ;;  %v1566_v63 = vpop.permute.xlu1 %1565  ;;  %v661_v40 = vrot.slane %v1985_v61, 4 }
  0x96   : > { %v1568_v21 = vunpack.i.h.bf16 %v1566_v63  ;;  %v1567_v56 = vunpack.i.l.bf16 %v1566_v63 }
  0x97   : > { %v724_v59 = vsel %vm723_vm5, %v700_v58, %v1557_v48  ;;  %v725_v54 = vsel %vm723_vm5, %v701_v17, %v1558_v45  ;;  %v683_v17 = vrot.slane %v2026_v29, 4 }
  0x98   : > { %v1571_v3 = vpop.permute.xlu0 %1570  ;;  %v748_v6 = vsel %vm747_vm6, %v724_v59, %v1562_v1  ;;  %v712_v4 = vsel %vm699_vm4, %v1935_v28, %v1567_v56  ;;  %v702_v34 = vsel %vm699_vm4, %v1915_v15, %v1568_v21  ;;  %v659_v28 = vrot.slane %v1951_v42, 4 }
  0x99   : > { %v1573_v11 = vunpack.i.h.bf16 %v1571_v3  ;;  %v1572_v22 = vunpack.i.l.bf16 %v1571_v3  ;;  %v1576_v12 = vpop.permute.xlu1 %1575  ;;  %909 = vmatmul.mubr.f32.vlgmr.msra.gmra.mrb[0].mxu0 %v748_v6  ;;  %v749_v39 = vsel %vm747_vm6, %v725_v54, %v1563_v13  ;;  %v663_v56 = vrot.slane %v2016_v24, 4 }
  0x9a   : > { %v1577_v27 = vunpack.i.l.bf16 %v1576_v12  ;;  %1350 = vmatprep.mubr.msk.f32.mxu0 %vm699_vm4, %v2222_v49  ;;  %v1578_v55 = vunpack.i.h.bf16 %v1576_v12  ;;  %v660_v2 = vsel %vm651_vm3, %v657_v44, %v659_v28  ;;  %v662_v6 = vsel %vm651_vm3, %v659_v28, %v661_v40 }
  0x9b   : > { %v736_v57 = vsel %vm723_vm5, %v712_v4, %v1572_v22  ;;  %v726_v20 = vsel %vm723_vm5, %v702_v34, %v1573_v11 }
  0x9c   : > { %v1581_v19 = vpop.permute.xlu0 %1580  ;;  %v760_v35 = vsel %vm747_vm6, %v736_v57, %v1577_v27  ;;  %v750_v48 = vsel %vm747_vm6, %v726_v20, %v1578_v55 }
  0x9d   : > { %v1583_v47 = vunpack.i.h.bf16 %v1581_v19  ;;  %v1582_v36 = vunpack.i.l.bf16 %v1581_v19  ;;  %v1586_v49 = vpop.permute.xlu1 %1585  ;;  %914 = vmatmul.mubr.f32.gmra.mrb[2].mxu0 %v749_v39  ;;  %969 = vmatmul.mubr.f32.vlgmr.msra.gmra.mrb[0].mxu1 %v760_v35 }
  0x9e   : > { %v1588_v15 = vunpack.i.h.bf16 %v1586_v49  ;;  %v1587_v37 = vunpack.i.l.bf16 %v1586_v49  ;;  %1351 = vmatprep.mubr.msk.f32.mxu0 %vm699_vm4, %v658_v14  ;;  %1362 = vmatprep.mubr.msk.f32.mxu1 %vm699_vm4, %v2230_v51  ;;  %v682_v51 = vsel %vm651_vm3, %v679_v9, %v681_v50  ;;  %v664_v14 = vsel %vm651_vm3, %v661_v40, %v663_v56 }
  0x9f   : > { %v713_v38 = vsel %vm699_vm4, %v1941_v32, %v1582_v36  ;;  %v703_v46 = vsel %vm699_vm4, %v1926_v23, %v1583_v47  ;;  %v665_v47 = vrot.slane %v2052_v52, 4  ;;  %v685_v36 = vrot.slane %v2055_v53, 4 }
  0xa0   : > { %v1591_v45 = vpop.permute.xlu0 %1590  ;;  %v737_v23 = vsel %vm723_vm5, %v713_v38, %v1587_v37  ;;  %v727_v59 = vsel %vm723_vm5, %v703_v46, %v1588_v15 }
  0xa1   : > { %v1593_v63 = vunpack.i.h.bf16 %v1591_v45  ;;  %v1592_v1 = vunpack.i.l.bf16 %v1591_v45  ;;  %v1596_v21 = vpop.permute.xlu1 %1595  ;;  %919 = vmatmul.mubr.f32.gmra.mrb[4].mxu0 %v750_v48  ;;  %v666_v40 = vsel %vm651_vm3, %v663_v56, %v665_v47  ;;  %v686_v45 = vsel %vm651_vm3, %v683_v17, %v685_v36 }
  0xa2   : > { %v1598_v58 = vunpack.i.h.bf16 %v1596_v21  ;;  %v1597_v32 = vunpack.i.l.bf16 %v1596_v21  ;;  %1352 = vmatprep.mubr.msk.f32.mxu0 %vm699_vm4, %v660_v2 }
  0xa3   : > { %v761_v44 = vsel %vm747_vm6, %v737_v23, %v1592_v1  ;;  %v751_v3 = vsel %vm747_vm6, %v727_v59, %v1593_v63 }
  0xa4   : > { %v1601_v4 = vpop.permute.xlu0 %1600  ;;  %974 = vmatmul.mubr.f32.gmra.mrb[2].mxu1 %v761_v44  ;;  %v704_v9 = vsel %vm699_vm4, %v1951_v42, %v1598_v58  ;;  %v714_v11 = vsel %vm699_vm4, %v1954_v43, %v1597_v32  ;;  %v684_v42 = vsel %vm651_vm3, %v681_v50, %v683_v17  ;;  %v687_v58 = vrot.slane %v2096_v26, 4 }
  0xa5   : > { %v1603_v22 = vunpack.i.h.bf16 %v1601_v4  ;;  %v1602_v12 = vunpack.i.l.bf16 %v1601_v4  ;;  %v1606_v54 = vpop.permute.xlu1 %1605  ;;  %924 = vmatmul.mubr.f32.gmra.mrb[6].mxu0 %v751_v3  ;;  %1363 = vmatprep.mubr.msk.f32.mxu1 %vm699_vm4, %v682_v51 }
  0xa6   : > { %v1608_v13 = vunpack.i.h.bf16 %v1606_v54  ;;  %v1607_v27 = vunpack.i.l.bf16 %v1606_v54  ;;  %1353 = vmatprep.mubr.msk.f32.mxu0 %vm699_vm4, %v662_v6 }
  0xa7   : > { %v728_v34 = vsel %vm723_vm5, %v704_v9, %v1603_v22  ;;  %v738_v57 = vsel %vm723_vm5, %v714_v11, %v1602_v12 }
  0xa8   : > { %v1611_v28 = vpop.permute.xlu0 %1610  ;;  %v752_v43 = vsel %vm747_vm6, %v728_v34, %v1608_v13  ;;  %v762_v55 = vsel %vm747_vm6, %v738_v57, %v1607_v27  ;;  %v669_v34 = vrot.slane %v2101_v31, 4  ;;  %v689_v57 = vrot.slane %v2104_v33, 4 }
  0xa9   : > { %v1613_v19 = vunpack.i.h.bf16 %v1611_v28  ;;  %v1612_v39 = vunpack.i.l.bf16 %v1611_v28  ;;  %v1616_v35 = vpop.permute.xlu1 %1615  ;;  %929 = vmatmul.mubr.f32.gmra.mrb[8].mxu0 %v752_v43  ;;  %979 = vmatmul.mubr.f32.gmra.mrb[4].mxu1 %v762_v55 }
  0xaa   : > { %v1618_v49 = vunpack.i.h.bf16 %v1616_v35  ;;  %v1617_v20 = vunpack.i.l.bf16 %v1616_v35  ;;  %1354 = vmatprep.mubr.msk.f32.mxu0 %vm699_vm4, %v664_v14  ;;  %1364 = vmatprep.mubr.msk.f32.mxu1 %vm699_vm4, %v684_v42 }
  0xab   : > { %v705_v50 = vsel %vm699_vm4, %v1985_v61, %v1613_v19  ;;  %v715_v15 = vsel %vm699_vm4, %v1988_v62, %v1612_v39  ;;  %v667_v62 = vrot.slane %v2081_v16, 4 }
  0xac   : > { %v1621_v37 = vpop.permute.xlu0 %1620  ;;  %v729_v1 = vsel %vm723_vm5, %v705_v50, %v1618_v49  ;;  %v739_v21 = vsel %vm723_vm5, %v715_v15, %v1617_v20 }
  0xad   : > { %v1623_v2 = vunpack.i.h.bf16 %v1621_v37  ;;  %v1622_v38 = vunpack.i.l.bf16 %v1621_v37  ;;  %v1626_v46 = vpop.permute.xlu1 %1625  ;;  %v668_v11 = vsel %vm651_vm3, %v665_v47, %v667_v62  ;;  %v670_v47 = vsel %vm651_vm3, %v667_v62, %v669_v34 }
  0xae   : > { %v1628_v48 = vunpack.i.h.bf16 %v1626_v46  ;;  %v1627_v63 = vunpack.i.l.bf16 %v1626_v46 }
  0xaf   : > { %v753_v51 = vsel %vm747_vm6, %v729_v1, %v1623_v2  ;;  %v763_v61 = vsel %vm747_vm6, %v739_v21, %v1622_v38  ;;  %v691_v2 = vrot.slane %v2147_v8, 4 }
  0xb0   : > { %v1631_v32 = vpop.permute.xlu0 %1630  ;;  %934 = vmatmul.mubr.f32.gmra.mrb[10].mxu0 %v753_v51  ;;  %984 = vmatmul.mubr.f32.gmra.mrb[6].mxu1 %v763_v61  ;;  %v706_v56 = vsel %vm699_vm4, %v2016_v24, %v1628_v48  ;;  %v716_v23 = vsel %vm699_vm4, %v2026_v29, %v1627_v63  ;;  %v688_v24 = vsel %vm651_vm3, %v685_v36, %v687_v58 }
  0xb1   : > { %v1633_v59 = vunpack.i.h.bf16 %v1631_v32  ;;  %v1632_v44 = vunpack.i.l.bf16 %v1631_v32  ;;  %v1636_v3 = vpop.permute.xlu1 %1635  ;;  %1355 = vmatprep.mubr.msk.f32.mxu0 %vm699_vm4, %v666_v40  ;;  %1365 = vmatprep.mubr.msk.f32.mxu1 %vm699_vm4, %v686_v45  ;;  %v690_v36 = vsel %vm651_vm3, %v687_v58, %v689_v57 }
  0xb2   : > { %v1638_v6 = vunpack.i.h.bf16 %v1636_v3  ;;  %v1637_v17 = vunpack.i.l.bf16 %v1636_v3 }
  0xb3   : > { %v730_v4 = vsel %vm723_vm5, %v706_v56, %v1633_v59  ;;  %v740_v9 = vsel %vm723_vm5, %v716_v23, %v1632_v44  ;;  %v693_v44 = vrot.slane %v2194_v60, 4 }
  0xb4   : > { %v1641_v22 = vpop.permute.xlu0 %1640  ;;  %v754_v29 = vsel %vm747_vm6, %v730_v4, %v1638_v6  ;;  %v764_v12 = vsel %vm747_vm6, %v740_v9, %v1637_v17 }
  0xb5   : > { %v1643_v54 = vunpack.i.h.bf16 %v1641_v22  ;;  %v1642_v13 = vunpack.i.l.bf16 %v1641_v22  ;;  %v1646_v27 = vpop.permute.xlu1 %1645  ;;  %939 = vmatmul.mubr.f32.gmra.mrb[12].mxu0 %v754_v29  ;;  %989 = vmatmul.mubr.f32.gmra.mrb[8].mxu1 %v764_v12  ;;  %v694_v12 = vsel %vm651_vm3, %v691_v2, %v693_v44 }
  0xb6   : > { %v1648_v14 = vunpack.i.h.bf16 %v1646_v27  ;;  %v1647_v42 = vunpack.i.l.bf16 %v1646_v27  ;;  %1356 = vmatprep.mubr.msk.f32.mxu0 %vm699_vm4, %v668_v11  ;;  %1366 = vmatprep.mubr.msk.f32.mxu1 %vm699_vm4, %v688_v24 }
  0xb7   : > { %v707_v28 = vsel %vm699_vm4, %v2052_v52, %v1643_v54  ;;  %v717_v43 = vsel %vm699_vm4, %v2055_v53, %v1642_v13  ;;  %v671_v53 = vrot.slane %v2144_v7, 4 }
  0xb8   : > { %v1651_v55 = vpop.permute.xlu0 %1650  ;;  %v731_v50 = vsel %vm723_vm5, %v707_v28, %v1648_v14  ;;  %v741_v15 = vsel %vm723_vm5, %v717_v43, %v1647_v42 }
  0xb9   : > { %v1653_v19 = vunpack.i.h.bf16 %v1651_v55  ;;  %v1652_v39 = vunpack.i.l.bf16 %v1651_v55  ;;  %v1656_v35 = vpop.permute.xlu1 %1655  ;;  %v672_v62 = vsel %vm651_vm3, %v669_v34, %v671_v53  ;;  %v674_v29 = vsel %vm651_vm3, %v671_v53, %v673_v25 }
  0xba   : > { %v1658_v49 = vunpack.i.h.bf16 %v1656_v35  ;;  %v1657_v20 = vunpack.i.l.bf16 %v1656_v35 }
  0xbb   : > { %v755_v37 = vsel %vm747_vm6, %v731_v50, %v1653_v19  ;;  %v765_v52 = vsel %vm747_vm6, %v741_v15, %v1652_v39 }
  0xbc   : > { %v1661_v38 = vpop.permute.xlu0 %1660  ;;  %944 = vmatmul.mubr.f32.gmra.mrb[14].mxu0 %v755_v37  ;;  %994 = vmatmul.mubr.f32.gmra.mrb[10].mxu1 %v765_v52  ;;  %v708_v46 = vsel %vm699_vm4, %v2081_v16, %v1658_v49  ;;  %v718_v40 = vsel %vm699_vm4, %v2096_v26, %v1657_v20  ;;  %v692_v16 = vsel %vm651_vm3, %v689_v57, %v691_v2 }
  0xbd   : > { %v1663_v45 = vunpack.i.h.bf16 %v1661_v38  ;;  %v1662_v48 = vunpack.i.l.bf16 %v1661_v38  ;;  %v1666_v63 = vpop.permute.xlu1 %1665  ;;  %1357 = vmatprep.mubr.msk.f32.mxu0 %vm699_vm4, %v670_v47  ;;  %1367 = vmatprep.mubr.msk.f32.mxu1 %vm699_vm4, %v690_v36 }
  0xbe   : > { %v1668_v1 = vunpack.i.h.bf16 %v1666_v63  ;;  %v1667_v21 = vunpack.i.l.bf16 %v1666_v63 }
  0xbf   : > { %v732_v51 = vsel %vm723_vm5, %v708_v46, %v1663_v45  ;;  %v742_v61 = vsel %vm723_vm5, %v718_v40, %v1662_v48 }
  0xc0   : > { %v1671_v58 = vpop.permute.xlu0 %1670  ;;  %v756_v26 = vsel %vm747_vm6, %v732_v51, %v1668_v1  ;;  %v766_v32 = vsel %vm747_vm6, %v742_v61, %v1667_v21  ;;  %v1153_v51 = vld [vmem:[%s2653_s4 + $0x8] sm:$0xff] }
  0xc1   : > { %v1673_v56 = vunpack.i.h.bf16 %v1671_v58  ;;  %v1672_v23 = vunpack.i.l.bf16 %v1671_v58  ;;  %v1676_v59 = vpop.permute.xlu1 %1675  ;;  %949 = vmatmul.mubr.f32.gmra.mrb[16].mxu0 %v756_v26  ;;  %999 = vmatmul.mubr.f32.gmra.mrb[12].mxu1 %v766_v32  ;;  %v1156_v58 = vld [vmem:[%s2653_s4 + $0x20] sm:$0xff]  ;;  %v1157_v26 = vld [vmem:[%s2653_s4 + $0x28] sm:$0xff] }
  0xc2   : > { %v1678_v3 = vunpack.i.h.bf16 %v1676_v59  ;;  %v1677_v6 = vunpack.i.l.bf16 %v1676_v59  ;;  %1358 = vmatprep.mubr.msk.f32.mxu0 %vm699_vm4, %v672_v62  ;;  %1368 = vmatprep.mubr.msk.f32.mxu1 %vm699_vm4, %v692_v16  ;;  %v1154_v62 = vld [vmem:[%s2653_s4 + $0x10] sm:$0xff]  ;;  %v1467_v32 = vpack.c.bf16 %v1157_v26, %v1156_v58 }
  0xc3   : > { %v709_v17 = vsel %vm699_vm4, %v2101_v31, %v1673_v56  ;;  %v719_v4 = vsel %vm699_vm4, %v2104_v33, %v1672_v23  ;;  %v1158_v56 = vld [vmem:[%s2653_s4 + $0x30] sm:$0xff]  ;;  %v1159_v23 = vld [vmem:[%s2653_s4 + $0x38] sm:$0xff] }
  0xc4   : > { %v1681_v9 = vpop.permute.xlu0 %1680  ;;  %v733_v27 = vsel %vm723_vm5, %v709_v17, %v1678_v3  ;;  %v743_v34 = vsel %vm723_vm5, %v719_v4, %v1677_v6  ;;  %v1470_v59 = vpack.c.bf16 %v1159_v23, %v1158_v56  ;;  %v1161_v3 = vld [vmem:[%s2653_s4 + $0x48] sm:$0xff]  ;;  %v1162_v17 = vld [vmem:[%s2653_s4 + $0x50] sm:$0xff]  ;;  %v1163_v4 = vld [vmem:[%s2653_s4 + $0x58] sm:$0xff] }
  0xc5   : > { %v1683_v11 = vunpack.i.h.bf16 %v1681_v9  ;;  %v1682_v24 = vunpack.i.l.bf16 %v1681_v9  ;;  %v1686_v22 = vpop.permute.xlu1 %1685  ;;  %v1476_v9 = vpack.c.bf16 %v1163_v4, %v1162_v17 }
  0xc6   : > { %v1688_v54 = vunpack.i.h.bf16 %v1686_v22  ;;  %v1687_v13 = vunpack.i.l.bf16 %v1686_v22 }
  0xc7   : > { %v757_v31 = vsel %vm747_vm6, %v733_v27, %v1683_v11  ;;  %v767_v33 = vsel %vm747_vm6, %v743_v34, %v1682_v24  ;;  %v1164_v11 = vld [vmem:[%s2653_s4 + $0x60] sm:$0xff]  ;;  %v1165_v24 = vld [vmem:[%s2653_s4 + $0x68] sm:$0xff]  ;;  %v1047_v27 = vlaneseq }
  0xc8   : > { %v1691_v57 = vpop.permute.xlu0 %1690  ;;  %954 = vmatmul.mubr.f32.gmra.mrb[18].mxu0 %v757_v31  ;;  %1004 = vmatmul.mubr.f32.gmra.mrb[14].mxu1 %v767_v33  ;;  %v710_v14 = vsel %vm699_vm4, %v2144_v7, %v1688_v54  ;;  %v720_v25 = vsel %vm699_vm4, %v2147_v8, %v1687_v13  ;;  %v696_v7 = vsel %vm651_vm3, %v693_v44, %v695_v5  ;;  %v1160_v44 = vld [vmem:[%s2653_s4 + $0x40] sm:$0xff]  ;;  %v1783_v13 = vmov 0.0  }
  0xc9   : > { %v1693_v42 = vunpack.i.h.bf16 %v1691_v57  ;;  %v1692_v28 = vunpack.i.l.bf16 %v1691_v57  ;;  %v1696_v43 = vpop.permute.xlu1 %1695  ;;  %1359 = vmatprep.mubr.msk.f32.mxu0 %vm699_vm4, %v674_v29  ;;  %1369 = vmatprep.mubr.msk.f32.mxu1 %vm699_vm4, %v694_v12  ;;  %v1473_v6 = vpack.c.bf16 %v1161_v3, %v1160_v44  ;;  %v1479_v22 = vpack.c.bf16 %v1165_v24, %v1164_v11  ;;  %v1166_v29 = vld [vmem:[%s2653_s4 + $0x70] sm:$0xff]  ;;  %v1167_v12 = vld [vmem:[%s2653_s4 + $0x78] sm:$0xff]  ;;  %v2509_v34 = vld [vmem:[%s2651_s2] ss:$0 sm:$0xff] }
  0xca   : > { %v1698_v55 = vunpack.i.h.bf16 %v1696_v43  ;;  %v1697_v19 = vunpack.i.l.bf16 %v1696_v43  ;;  %v1482_v54 = vpack.c.bf16 %v1167_v12, %v1166_v29  ;;  %v1048_v31 = vshrl.u32 %v1047_v27, 7 }
  0xcb   : > { %v734_v39 = vsel %vm723_vm5, %v710_v14, %v1693_v42  ;;  %v744_v35 = vsel %vm723_vm5, %v720_v25, %v1692_v28  ;;  %v1372_v25 = vld [vmem:[%s2652_s3] ss:$0 sm:$0xff] }
  0xcc   : > { %v1701_v47 = vpop.permute.xlu0 %1700  ;;  %v758_v8 = vsel %vm747_vm6, %v734_v39, %v1698_v55  ;;  %v768_v36 = vsel %vm747_vm6, %v744_v35, %v1697_v19  ;;  %v1049_v14 = vadd.s32 8, %v1048_v31  ;;  %vm2516_vm8 = vcmp.lt.s32.totalorder %v1048_v31, %v1372_v25 }
  0xcd   : > { %v1703_v49 = vunpack.i.h.bf16 %v1701_v47  ;;  %v1702_v20 = vunpack.i.l.bf16 %v1701_v47  ;;  %v1706_v50 = vpop.permute.xlu1 %1705  ;;  %959 = vmatmul.mubr.f32.gmra.mrb[20].mxu0 %v758_v8  ;;  %1009 = vmatmul.mubr.f32.gmra.mrb[16].mxu1 %v768_v36  ;;  %v1050_v47 = vadd.s32 16, %v1048_v31 }
  0xce   : > { %v1708_v15 = vunpack.i.h.bf16 %v1706_v50  ;;  %v1707_v37 = vunpack.i.l.bf16 %v1706_v50  ;;  %1360 = vmatprep.mubr.msk.f32.mxu0 %vm699_vm4, %v2255_v30  ;;  %1370 = vmatprep.mubr.msk.f32.mxu1 %vm699_vm4, %v696_v7  ;;  %vm2520_vm9 = vcmp.lt.s32.totalorder %v1049_v14, %v1372_v25 }
  0xcf   : > { %v711_v5 = vsel %vm699_vm4, %v2191_v18, %v1703_v49  ;;  %v721_v52 = vsel %vm699_vm4, %v2194_v60, %v1702_v20  ;;  %vm2530_vm10 = vcmp.lt.s32.totalorder %v1050_v47, %v1372_v25 }
  0xd0   : > { %v1711_v53 = vpop.permute.xlu0 %1710  ;;  %v735_v45 = vsel %vm723_vm5, %v711_v5, %v1708_v15  ;;  %v745_v48 = vsel %vm723_vm5, %v721_v52, %v1707_v37 }
  0xd1   : > { %v1713_v2 = vunpack.i.h.bf16 %v1711_v53  ;;  %v1712_v38 = vunpack.i.l.bf16 %v1711_v53  ;;  %v393_v46 = vpop.permute.xlu1 %392 }
  0xd2   : > { %v722_v40 = vsel %vm699_vm4, %v2152_v10, %v393_v46  ;;  %v1152_v10 = vld [vmem:[%s2653_s4] sm:$0xff] }
  0xd3   : > { %v759_v30 = vsel %vm747_vm6, %v735_v45, %v1713_v2  ;;  %v769_v63 = vsel %vm747_vm6, %v745_v48, %v1712_v38  ;;  %v1461_v61 = vpack.c.bf16 %v1153_v51, %v1152_v10 }
  0xd4   : > { %v510_v1 = vpop.permute.xlu0 %509  ;;  %964 = vmatmul.mubr.f32.gmra.mrb[22].mxu0 %v759_v30  ;;  %1014 = vmatmul.mubr.f32.gmra.mrb[18].mxu1 %v769_v63 }
  0xd5   : > { %v746_v18 = vsel %vm723_vm5, %v722_v40, %v510_v1  ;;  %v627_v60 = vpop.permute.xlu1 %626  ;;  %1371 = vmatprep.mubr.msk.f32.mxu1 %vm699_vm4, %v2276_v41  ;;  %1462 = vmatpush3.bf16.msra.mxu1 %v1461_v61  ;;  %v1155_v41 = vld [vmem:[%s2653_s4 + $0x18] sm:$0xff] }
  0xd6   : > { %v770_v21 = vsel %vm747_vm6, %v746_v18, %v627_v60  ;;  %1463 = vmatprep.subr.bf16.mxu1 %v1778_v0  ;;  %v1464_v16 = vpack.c.bf16 %v1155_v41, %v1154_v62 }
  0xd8   : > { %1019 = vmatmul.mubr.f32.gmra.mrb[20].mxu1 %v770_v21 }
  0xd9   : > { %1465 = vmatpush3.bf16.msra.mxu1 %v1464_v16  ;;  %1427 = vmatprep.mubr.msk.f32.mxu1 %vm1782_vm7, %v1783_v13 }
  0xda   : > { %1466 = vmatprep.subr.bf16.mxu1 %v1778_v0 }
  0xdd   : > { %1468 = vmatpush3.bf16.msra.mxu1 %v1467_v32 }
  0xde   : > { %1469 = vmatprep.subr.bf16.mxu1 %v1778_v0 }
  0xe1   : > { %1471 = vmatpush3.bf16.msra.mxu1 %v1470_v59 }
  0xe2   : > { %1472 = vmatprep.subr.bf16.mxu1 %v1778_v0 }
  0xe5   : > { %1474 = vmatpush3.bf16.msra.mxu1 %v1473_v6 }
  0xe6   : > { %1475 = vmatprep.subr.bf16.mxu1 %v1778_v0 }
  0xe9   : > { %1477 = vmatpush3.bf16.msra.mxu1 %v1476_v9 }
  0xea   : > { %1478 = vmatprep.subr.bf16.mxu1 %v1778_v0 }
  0xed   : > { %1480 = vmatpush3.bf16.msra.mxu1 %v1479_v22 }
  0xee   : > { %1481 = vmatprep.subr.bf16.mxu1 %v1778_v0 }
  0xf1   : > { %1483 = vmatpush3.bf16.msra.mxu1 %v1482_v54 }
 0x16c   : > { %v910_v0 = vpop.f32.mrb[0].mxu0 }
 0x16d   : > { %v911_v33 = vadd.f32 %v2509_v34, %v910_v0  ;;  %v912_v57 = vpop.f32.mrb[1].mxu0 }
 0x16f   : > { %v1024_v43 = vmax.f32 %v911_v33, 0.0 }
 0x170   : > { %v915_v42 = vpop.f32.mrb[2].mxu0  ;;  %v970_v28 = vpop.f32.mrb[0].mxu1 }
 0x171   : > { %v916_v55 = vadd.f32 %v2509_v34, %v915_v42  ;;  %v917_v19 = vpop.f32.mrb[3].mxu0  ;;  %v972_v39 = vpop.f32.mrb[1].mxu1  ;;  %v971_v36 = vadd.f32 %v2509_v34, %v970_v28  ;;  %v1065_v20 = vsel %vm2516_vm8, %v1024_v43, 0.0 }
 0x173   : > { %v1025_v8 = vmax.f32 %v916_v55, 0.0  ;;  %v1036_v38 = vmax.f32 %v971_v36, 0.0 }
 0x174   : > { %v920_v49 = vpop.f32.mrb[4].mxu0 }
 0x175   : > { %v1066_v50 = vsel %vm2520_vm9, %v1025_v8, 0.0  ;;  %v921_v15 = vadd.f32 %v2509_v34, %v920_v49  ;;  %v922_v37 = vpop.f32.mrb[5].mxu0  ;;  %v1077_v60 = vsel %vm2516_vm8, %v1036_v38, 0.0 }
 0x176   : > { %v1088_v5 = vmax.f32 %v1065_v20, %v1066_v50 }
 0x177   : > { %v1026_v53 = vmax.f32 %v921_v15, 0.0  ;;  %v975_v2 = vpop.f32.mrb[2].mxu1 }
 0x178   : > { %v976_v46 = vadd.f32 %v2509_v34, %v975_v2  ;;  %v925_v40 = vpop.f32.mrb[6].mxu0  ;;  %v977_v45 = vpop.f32.mrb[3].mxu1 }
 0x179   : > { %v1067_v48 = vsel %vm2530_vm10, %v1026_v53, 0.0  ;;  %v926_v30 = vadd.f32 %v2509_v34, %v925_v40  ;;  %v927_v63 = vpop.f32.mrb[7].mxu0 }
 0x17a   : > { %v1089_v1 = vmax.f32 %v1088_v5, %v1067_v48  ;;  %v1037_v18 = vmax.f32 %v976_v46, 0.0 }
 0x17b   : > { %v1027_v62 = vmax.f32 %v926_v30, 0.0 }
 0x17c   : > { %v1078_v21 = vsel %vm2520_vm9, %v1037_v18, 0.0  ;;  %v930_v10 = vpop.f32.mrb[8].mxu0  ;;  %v980_v51 = vpop.f32.mrb[4].mxu1  ;;  %v1090_v23 = vrot.slane %v1089_v1, 4 }
 0x17d   : > { %v1120_v61 = vmax.f32 %v1077_v60, %v1078_v21  ;;  %v931_v41 = vadd.f32 %v2509_v34, %v930_v10  ;;  %v981_v16 = vadd.f32 %v2509_v34, %v980_v51  ;;  %v932_v58 = vpop.f32.mrb[9].mxu0  ;;  %v982_v26 = vpop.f32.mrb[5].mxu1  ;;  %v1068_v59 = vsel %vm2516_vm8, %v1027_v62, 0.0 }
 0x17e   : > { %v1091_v11 = vmax.f32 %v1089_v1, %v1090_v23 }
 0x17f   : > { %v1028_v32 = vmax.f32 %v931_v41, 0.0  ;;  %v1038_v56 = vmax.f32 %v981_v16, 0.0 }
 0x180   : > { %v1092_v13 = vrot.slane %v1091_v11, 2 }
 0x181   : > { %v1069_v44 = vsel %vm2520_vm9, %v1028_v32, 0.0  ;;  %v1079_v3 = vsel %vm2530_vm10, %v1038_v56, 0.0 }
 0x182   : > { %v1096_v6 = vmax.f32 %v1068_v59, %v1069_v44  ;;  %v2550_v17 = vmax.f32 %v1120_v61, %v1079_v3  ;;  %v1093_v55 = vmax.f32 %v1091_v11, %v1092_v13 }
 0x183   : > { %v935_v4 = vpop.f32.mrb[10].mxu0  ;;  %v985_v9 = vpop.f32.mrb[6].mxu1 }
 0x184   : > { %v936_v24 = vadd.f32 %v2509_v34, %v935_v4  ;;  %v937_v22 = vpop.f32.mrb[11].mxu0  ;;  %v987_v29 = vpop.f32.mrb[7].mxu1  ;;  %v986_v12 = vadd.f32 %v2509_v34, %v985_v9  ;;  %v1094_v15 = vrot.slane %v1093_v55, 1 }
 0x186   : > { %v1029_v54 = vmax.f32 %v936_v24, 0.0  ;;  %v1039_v57 = vmax.f32 %v986_v12, 0.0  ;;  %v1095_v30 = vmax.f32 %v1093_v55, %v1094_v15 }
 0x188   : > { %v1070_v27 = vsel %vm2530_vm10, %v1029_v54, 0.0  ;;  %v940_v0 = vpop.f32.mrb[12].mxu0  ;;  %v990_v31 = vpop.f32.mrb[8].mxu1  ;;  %v1080_v47 = vsel %vm2516_vm8, %v1039_v57, 0.0 }
 0x189   : > { %v1097_v33 = vmax.f32 %v1096_v6, %v1070_v27  ;;  %v991_v14 = vadd.f32 %v2509_v34, %v990_v31  ;;  %v942_v25 = vpop.f32.mrb[13].mxu0  ;;  %v992_v42 = vpop.f32.mrb[9].mxu1  ;;  %v941_v19 = vadd.f32 %v2509_v34, %v940_v0 }
 0x18b   : > { %v1098_v28 = vrot.slane %v1097_v33, 4  ;;  %v1040_v43 = vmax.f32 %v991_v14, 0.0  ;;  %v1030_v37 = vmax.f32 %v941_v19, 0.0 }
 0x18d   : > { %v1099_v39 = vmax.f32 %v1097_v33, %v1098_v28  ;;  %v1081_v8 = vsel %vm2520_vm9, %v1040_v43, 0.0  ;;  %v1071_v63 = vsel %vm2516_vm8, %v1030_v37, 0.0 }
 0x18e   : > { %v1128_v36 = vmax.f32 %v1080_v47, %v1081_v8 }
 0x18f   : > { %v1100_v49 = vrot.slane %v1099_v39, 2  ;;  %v945_v20 = vpop.f32.mrb[14].mxu0  ;;  %v995_v50 = vpop.f32.mrb[10].mxu1 }
 0x190   : > { %v946_v5 = vadd.f32 %v2509_v34, %v945_v20  ;;  %v996_v53 = vadd.f32 %v2509_v34, %v995_v50  ;;  %v947_v2 = vpop.f32.mrb[15].mxu0  ;;  %v997_v38 = vpop.f32.mrb[11].mxu1 }
 0x191   : > { %v1101_v46 = vmax.f32 %v1099_v39, %v1100_v49 }
 0x192   : > { %v1031_v40 = vmax.f32 %v946_v5, 0.0  ;;  %v1041_v45 = vmax.f32 %v996_v53, 0.0 }
 0x193   : > { %v1102_v48 = vrot.slane %v1101_v46, 1 }
 0x194   : > { %v1072_v1 = vsel %vm2520_vm9, %v1031_v40, 0.0  ;;  %v1082_v18 = vsel %vm2530_vm10, %v1041_v45, 0.0  ;;  %v950_v60 = vpop.f32.mrb[16].mxu0  ;;  %v1000_v21 = vpop.f32.mrb[12].mxu1 }
 0x195   : > { %v1103_v10 = vmax.f32 %v1101_v46, %v1102_v48  ;;  %v1104_v51 = vmax.f32 %v1071_v63, %v1072_v1  ;;  %v1129_v61 = vmax.f32 %v1128_v36, %v1082_v18  ;;  %v951_v62 = vadd.f32 %v2509_v34, %v950_v60  ;;  %v952_v41 = vpop.f32.mrb[17].mxu0  ;;  %v1002_v16 = vpop.f32.mrb[13].mxu1 }
 0x196   : > { %v1001_v32 = vadd.f32 %v2509_v34, %v1000_v21  ;;  %v1122_v36 = vrot.slane %v2550_v17, 4 }
 0x197   : > { %v1184_v58 = vsel %vm1183_vm11, %v1103_v10, %v1095_v30  ;;  %v1032_v26 = vmax.f32 %v951_v62, 0.0  ;;  %v1130_v15 = vrot.slane %v1129_v61, 4 }
 0x198   : > { %v1042_v6 = vmax.f32 %v1001_v32, 0.0  ;;  %v1123_v48 = vmax.f32 %v2550_v17, %v1122_v36 }
 0x199   : > { %v1073_v56 = vsel %vm2530_vm10, %v1032_v26, 0.0  ;;  %v1131_v63 = vmax.f32 %v1129_v61, %v1130_v15 }
 0x19a   : > { %v1105_v23 = vmax.f32 %v1104_v51, %v1073_v56  ;;  %v1083_v54 = vsel %vm2516_vm8, %v1042_v6, 0.0  ;;  %v1124_v41 = vrot.slane %v1123_v48, 2 }
 0x19b   : > { %v955_v59 = vpop.f32.mrb[18].mxu0  ;;  %v1005_v44 = vpop.f32.mrb[14].mxu1 }
 0x19c   : > { %v1106_v3 = vrot.slane %v1105_v23, 4  ;;  %v1006_v4 = vadd.f32 %v2509_v34, %v1005_v44  ;;  %v957_v9 = vpop.f32.mrb[19].mxu0  ;;  %v1007_v11 = vpop.f32.mrb[15].mxu1  ;;  %v956_v24 = vadd.f32 %v2509_v34, %v955_v59  ;;  %v1125_v52 = vmax.f32 %v1123_v48, %v1124_v41 }
 0x19e   : > { %v1107_v22 = vmax.f32 %v1105_v23, %v1106_v3  ;;  %v1043_v29 = vmax.f32 %v1006_v4, 0.0  ;;  %v1033_v31 = vmax.f32 %v956_v24, 0.0  ;;  %v1126_v9 = vrot.slane %v1125_v52, 1 }
 0x1a0   : > { %v1108_v12 = vrot.slane %v1107_v22, 2  ;;  %v1084_v13 = vsel %vm2520_vm9, %v1043_v29, 0.0  ;;  %v960_v27 = vpop.f32.mrb[20].mxu0  ;;  %v1010_v0 = vpop.f32.mrb[16].mxu1  ;;  %v1074_v39 = vsel %vm2516_vm8, %v1033_v31, 0.0  ;;  %v1127_v7 = vmax.f32 %v1125_v52, %v1126_v9 }
 0x1a1   : > { %v1136_v33 = vmax.f32 %v1083_v54, %v1084_v13  ;;  %v961_v57 = vadd.f32 %v2509_v34, %v960_v27  ;;  %v1011_v14 = vadd.f32 %v2509_v34, %v1010_v0  ;;  %v962_v25 = vpop.f32.mrb[21].mxu0  ;;  %v1012_v42 = vpop.f32.mrb[17].mxu1 }
 0x1a2   : > { %v1109_v28 = vmax.f32 %v1107_v22, %v1108_v12 }
 0x1a3   : > { %v1034_v43 = vmax.f32 %v961_v57, 0.0  ;;  %v1044_v55 = vmax.f32 %v1011_v14, 0.0 }
 0x1a4   : > { %v1110_v19 = vrot.slane %v1109_v28, 1 }
 0x1a5   : > { %v1075_v47 = vsel %vm2520_vm9, %v1034_v43, 0.0  ;;  %v1085_v8 = vsel %vm2530_vm10, %v1044_v55, 0.0 }
 0x1a6   : > { %v1111_v49 = vmax.f32 %v1109_v28, %v1110_v19  ;;  %v1112_v20 = vmax.f32 %v1074_v39, %v1075_v47  ;;  %v1137_v50 = vmax.f32 %v1136_v33, %v1085_v8  ;;  %v1373_v28 = vld [vmem:[%s2654_s5] ss:$0 sm:$0xff] }
 0x1a7   : > { %v965_v37 = vpop.f32.mrb[22].mxu0  ;;  %v1015_v5 = vpop.f32.mrb[18].mxu1 }
 0x1a8   : > { %v1186_v53 = vsel %vm1185_vm12, %v1111_v49, %v1184_v58  ;;  %v1138_v2 = vrot.slane %v1137_v50, 4  ;;  %v966_v38 = vadd.f32 %v2509_v34, %v965_v37  ;;  %v1016_v46 = vadd.f32 %v2509_v34, %v1015_v5  ;;  %v967_v40 = vpop.f32.mrb[23].mxu0  ;;  %v1017_v45 = vpop.f32.mrb[19].mxu1 }
 0x1a9   : > { %v1132_v58 = vrot.slane %v1131_v63, 2 }
 0x1aa   : > { %v1035_v30 = vmax.f32 %v966_v38, 0.0  ;;  %v1139_v18 = vmax.f32 %v1137_v50, %v1138_v2  ;;  %v1045_v21 = vmax.f32 %v1016_v46, 0.0 }
 0x1ab   : > { %v1020_v1 = vpop.f32.mrb[20].mxu1  ;;  %v1133_v59 = vmax.f32 %v1131_v63, %v1132_v58 }
 0x1ac   : > { %v1076_v60 = vsel %vm2530_vm10, %v1035_v30, 0.0  ;;  %v1021_v10 = vadd.f32 %v2509_v34, %v1020_v1  ;;  %v1022_v51 = vpop.f32.mrb[21].mxu1  ;;  %v1140_v32 = vrot.slane %v1139_v18, 2  ;;  %v1086_v17 = vsel %vm2516_vm8, %v1045_v21, 0.0 }
 0x1ad   : > { %v1113_v62 = vmax.f32 %v1112_v20, %v1076_v60  ;;  %v1134_v11 = vrot.slane %v1133_v59, 1 }
 0x1ae   : > { %v1046_v16 = vmax.f32 %v1021_v10, 0.0  ;;  %v1141_v34 = vmax.f32 %v1139_v18, %v1140_v32 }
 0x1af   : > { %v1114_v26 = vrot.slane %v1113_v62, 4  ;;  %v1135_v54 = vmax.f32 %v1133_v59, %v1134_v11 }
 0x1b0   : > { %v1087_v61 = vsel %vm2520_vm9, %v1046_v16, 0.0  ;;  %v1142_v29 = vrot.slane %v1141_v34, 1 }
 0x1b1   : > { %v1115_v56 = vmax.f32 %v1113_v62, %v1114_v26  ;;  %v1144_v23 = vmax.f32 %v1086_v17, %v1087_v61 }
 0x1b2   : > { %v1143_v0 = vmax.f32 %v1141_v34, %v1142_v29 }
 0x1b3   : > { %v1116_v44 = vrot.slane %v1115_v56, 2  ;;  %v1145_v3 = vmax.f32 %v1144_v23, 0.0 }
 0x1b5   : > { %v1117_v6 = vmax.f32 %v1115_v56, %v1116_v44  ;;  %v1146_v4 = vrot.slane %v1145_v3, 4 }
 0x1b7   : > { %v1118_v24 = vrot.slane %v1117_v6, 1  ;;  %v1147_v22 = vmax.f32 %v1145_v3, %v1146_v4 }
 0x1b9   : > { %v1119_v35 = vmax.f32 %v1117_v6, %v1118_v24  ;;  %v1148_v12 = vrot.slane %v1147_v22, 2 }
 0x1bb   : > { %v1188_v13 = vsel %vm1187_vm13, %v1119_v35, %v1186_v53  ;;  %v1149_v27 = vmax.f32 %v1147_v22, %v1148_v12 }
 0x1bc   : > { %v1190_v31 = vsel %vm1189_vm14, %v1127_v7, %v1188_v13 }
 0x1bd   : > { %v1150_v33 = vrot.slane %v1149_v27, 1  ;;  %v1192_v57 = vsel %vm1191_vm15, %v1135_v54, %v1190_v31 }
 0x1be   : > { %v1194_v14 = vsel %vm1193_vm0, %v1143_v0, %v1192_v57 }
 0x1bf   : > { %v1151_v25 = vmax.f32 %v1149_v27, %v1150_v33 }
 0x1c1   : > { %v1196_v42 = vsel %vm1195_vm1, %v1151_v25, %v1194_v14 }
 0x1c2   : > { %1428 = vmatmul.mubr.f32.vlgmr.msra.gmra.mrb[22].mxu1 %v1196_v42 }
 0x295   : > { %v1264_v43 = vpop.f32.mrb[22].mxu1 }
 0x296   : > { %v1265_v55 = vadd.f32 %v1373_v28, %v1264_v43  ;;  %v1429_v19 = vpop.f32.mrb[23].mxu1 }
 0x298   : > { %1268 = vst [vmem:[%s245_s13] sm:$0xff] %v1265_v55 }
 0x299   : > { %1727 = shalt.err (!%p1724_p3)
}
 0x29a   : > { %s1728_s18 = scalar_lea.hbm %s2607_s19, 128  ;;  %s1732_s29 = scalar_lea.hbm %s2655_s6, 256 }
 0x29b   : > { %p1729_p4 = scmp.ne.s32.totalorder %s2607_s19, %s1728_s18  ;;  %p1733_p9 = scmp.lt.u32.totalorder %s2607_s19, %s2655_s6 }
 0x29c   : > { %p1734_p10 = scmp.lt.u32.totalorder %s1732_s29, %s1728_s18  ;;  %p1736_p12 = scmp.lt.u32.totalorder %s1728_s18, %s2607_s19 }
 0x29d   : > { %p1730_p7 = pnand %p1729_p4, %p1858_p5 }
 0x29e   : > { %p1735_p11 = por %p1734_p10, %p1733_p9 }
 0x29f   : > { %p1731_p8 = pneg %p1730_p7 }
 0x2a0   : > { %p1737_p13 = por %p1736_p12, %p1735_p11 }
 0x2a2   : > { %p1738_p0 = pnand %p1737_p13, %p1731_p8 }
 0x2a4   : > { %1741 = shalt.err (!%p1738_p0)
}
 0x2a5   : > { %1504 = dma.vmem_to_hbm [thread:$0]  (%p1858_p5), %s2609_s14, 128, %s2607_s19, %s1270_s9  }
 0x2a6 PF: > { %p1510_p1 = scmp.ge.s32.totalorder %s1776_s24, 2  ;;  %s1295_s13 = sand.u32 1, %s1764_s21  }
 0x2a7   : > { %s1296_s15 = scalar_lea.sflag [#allocation3], %s1295_s13 }
 0x2a8   : > { %p1507_p2 = pnand %p1510_p1, %p1862_p6 }
 0x2aa   : > { %1759 = dma.done.wait (!%p1507_p2), %s1296_s15, 128  }
 0x2ab   : > { %1761 = vsyncadd (!%p1507_p2), %s1296_s15, 4294967168  ;;  %p16_p3 = scmp.ge.s32.totalorder %s1845_s27, 4   ;;  %s2664_s21 = smov %s1768_s22 }
 0x2ac   : > { %s2665_s22 = smov %s1772_s23  ;;  %s2666_s23 = smov %s1856_s30 }
 0x2ad   : > { %s2667_s24 = smov %s1845_s27  ;;  %18 = sbr.rel (!%p16_p3) target bundleno = 3 (0x3), region = 79 }
 0x2b4   :  { %1301 = vsyncpa [#allocation3], 1 }
 0x2b5   :  { %1303 = vsyncpa [#allocation3 + $0x1], 1 }

</bundles_post_ra>
